<compile_context>
chip_gen: v5e
topology: v5e:2x2
jax: 0.10.0
libtpu: 0.0.40
codegen_flags: <defaults>
</compile_context>

<pallas_src>
import math
import functools

import jax
import jax.numpy as jnp
from jax import lax
from jax.experimental import pallas as pl
from jax.experimental.pallas import tpu as pltpu


def _round_up(x, m):
    return ((x + m - 1) // m) * m


# ----------------------------- Pallas kernel --------------------------------

def _conv_kernel(x_ref, w_ref, b_ref, o_ref, *, K, TH, Wo, stride):
    """Reflection-padded conv tile as K accumulated matmuls (one per kh tap).

    x_ref: (Hp*Wo, K*Cin)        kw-unfolded image of one batch element (VMEM)
    w_ref: (K, K*Cin, Cout_pad)  packed weights (kh-major taps)
    b_ref: (1, Cout_pad)         packed bias (f32)
    o_ref: (TH*Wo, Cout_pad)     output tile (flattened output rows)
    """
    t = pl.program_id(1)
    rows = TH * Wo
    base = t * (TH * stride * Wo)          # first flattened input row of tile

    acc = None
    for kh in range(K):                    # unrolled: K is small and static
        start = base + kh * Wo
        if Wo % 8 == 0:
            start = pl.multiple_of(start, 8)   # aligned sublane offset
        slab = x_ref[pl.ds(start, rows), :]    # (rows, K*Cin): already 2-D
        part = jnp.dot(slab, w_ref[kh], preferred_element_type=jnp.float32)
        acc = part if acc is None else acc + part     # value accumulation,
                                                      # single store below
    o_ref[...] = (acc + b_ref[...]).astype(o_ref.dtype)


def _pick_row_tile(Ho, Wo, stride, target_rows=512):
    """Output image rows processed per grid step."""
    if stride != 1:
        # One output row per step keeps the flattened input window contiguous
        # for any stride (no strided loads in the kernel).
        # TODO(synk): fold the H-stride phase into the row axis in the wrapper
        # (space-to-depth) so strided layers can use taller tiles as well.
        return 1
    cap = max(1, min(Ho, max(1, target_rows // max(Wo, 1))))
    for th in range(cap, 0, -1):
        if Ho % th == 0:
            return th
    return 1


def _fused_conv(x2d, w_packed, b_packed, *, K, stride, Ho, Wo,
                single_buffer_consts=True):
    """x2d: [N, Hp*Wo, K*Cin]; w_packed: [K, K*Cin, Cout_pad];
    b_packed: [1, Cout_pad] -> [N, Ho*Wo, Cout_pad] float32."""
    N, R, KC = x2d.shape
    Kw, KC_w, Cout_pad = w_packed.shape
    assert Kw == K and KC_w == KC

    TH = _pick_row_tile(Ho, Wo, stride)
    nrt = Ho // TH
    rows = TH * Wo

    kernel = functools.partial(_conv_kernel, K=K, TH=TH, Wo=Wo, stride=stride)

    # Weight / bias block indices never change -> one VMEM buffer is enough.
    def _const_spec(shape, index_map):
        if single_buffer_consts:
            try:
                return pl.BlockSpec(shape, index_map,
                                    pipeline_mode=pl.Buffered(1))
            except Exception:   # Pallas build without pipeline_mode support
                pass
        return pl.BlockSpec(shape, index_map)

    in_specs = [
        # Whole kw-unfolded image of one batch element; block index constant
        # across t, so it is fetched once per n.
        # TODO(synk): for very large images on v7x (64 MiB VMEM), switch this
        # to a halo'd row-window via memory_space=pl.ANY + make_async_copy so
        # the resident block is O(TH*Wo*K*Cin) instead of O(Hp*Wo*K*Cin).
        pl.BlockSpec((None, R, KC), lambda n, t: (n, 0, 0)),
        _const_spec((K, KC, Cout_pad), lambda n, t: (0, 0, 0)),
        _const_spec((1, Cout_pad), lambda n, t: (0, 0)),
    ]
    out_spec = pl.BlockSpec((None, rows, Cout_pad), lambda n, t: (n, t, 0))

    # Generation-aware VMEM budget: block bytes + headroom, capped below the
    # physical VMEM of the current generation (no fixed 48 MiB cap).
    csize = jnp.dtype(x2d.dtype).itemsize
    in_blk = _round_up(R, 8) * max(_round_up(KC, 128), 128) * csize
    out_blk = rows * Cout_pad * 4
    w_blk = K * _round_up(KC, 8) * Cout_pad * csize + 8 * Cout_pad * 4
    est = 2 * in_blk + 2 * out_blk + (1 if single_buffer_consts else 2) * w_blk
    est = int(1.25 * est) + (2 << 20)
    try:
        vmem_cap = int(pltpu.get_tpu_info().vmem_capacity_bytes)
    except Exception:
        vmem_cap = 64 * 1024 * 1024            # conservative (v7x per-core)
    vmem_limit = int(min(max(est, 32 * 1024 * 1024), int(0.85 * vmem_cap)))

    flops = 2 * N * Ho * Wo * K * KC * Cout_pad
    bytes_accessed = int(x2d.size * csize + w_packed.size * csize
                         + b_packed.size * 4 + N * Ho * Wo * Cout_pad * 4)

    return pl.pallas_call(
        kernel,
        out_shape=jax.ShapeDtypeStruct((N, Ho * Wo, Cout_pad), jnp.float32),
        grid_spec=pltpu.PrefetchScalarGridSpec(
            num_scalar_prefetch=0,
            grid=(N, nrt),
            in_specs=in_specs,
            out_specs=out_spec,
        ),
        compiler_params=pltpu.CompilerParams(
            # Batch axis first: a megacore split lands on n (independent
            # images), so the per-image input block is not fetched twice.
            dimension_semantics=("parallel", "parallel"),
            vmem_limit_bytes=vmem_limit),
        cost_estimate=pl.CostEstimate(
            flops=flops, transcendentals=0, bytes_accessed=bytes_accessed),
    )(x2d, w_packed, b_packed)


# ----------------------------- ConvLayer wrapper -----------------------------

class ConvLayer:
    """JAX/Pallas equivalent of the PyTorch ConvLayer (ReflectionPad2d + Conv2d)."""

    def __init__(self, in_channels, out_channels, kernel_size, stride, key,
                 compute_dtype=jnp.bfloat16):
        self.in_channels = in_channels
        self.out_channels = out_channels
        self.kernel_size = kernel_size
        self.stride = stride
        self.reflection_padding = int(math.floor(kernel_size / 2))
        self.compute_dtype = compute_dtype

        # Deterministic synthetic init (shapes mirror torch.nn.Conv2d), f32
        # master copies kept for reference checks.
        kw_key, kb_key = jax.random.split(key)
        fan_in = in_channels * kernel_size * kernel_size
        bound = 1.0 / math.sqrt(fan_in)
        self.weight = jax.random.uniform(
            kw_key, (out_channels, in_channels, kernel_size, kernel_size),
            jnp.float32, -bound, bound)
        self.bias = jax.random.uniform(
            kb_key, (out_channels,), jnp.float32, -bound, bound)

        # Pack weights ONCE: (Cout,Cin,K,K) -> (K, K*Cin, Cout_pad); kh-major
        # taps with a (kw, cin) contraction axis matching the kw-unfolded
        # activations.  Cout padded to 128 lanes (256 when Cout > 128 so the
        # v7x 2x256 MXU N-dimension is fully used).  Operands stored in the
        # compute dtype (bf16 default) -> f32 accumulation happens in the MXU.
        K = kernel_size
        lane = 256 if out_channels > 128 else 128
        Cout_pad = _round_up(out_channels, lane)
        w = jnp.transpose(self.weight, (2, 3, 1, 0)).reshape(
            K, K * in_channels, out_channels)
        self.w_packed = jnp.pad(
            w, ((0, 0), (0, 0), (0, Cout_pad - out_channels))
        ).astype(compute_dtype)
        self.b_packed = jnp.pad(self.bias, (0, Cout_pad - out_channels)
                                ).reshape(1, Cout_pad).astype(jnp.float32)
        self.Cout_pad = Cout_pad

    def __call__(self, x):
        """x: [N, Cin, H, W] (NCHW, float32) -> [N, Cout, Ho, Wo] (float32)."""
        N, Cin, H, W = x.shape
        K, s, p = self.kernel_size, self.stride, self.reflection_padding
        Cout = self.out_channels

        # NCHW -> NHWC + reflection pad (external API stays NCHW like PyTorch).
        x_nhwc = jnp.transpose(x, (0, 2, 3, 1))
        x_pad = jnp.pad(x_nhwc, ((0, 0), (p, p), (p, p), (0, 0)), mode="reflect")
        Hp, Wp = H + 2 * p, W + 2 * p
        Ho = (Hp - K) // s + 1
        Wo = (Wp - K) // s + 1

        # Pad the output-column count to a multiple of 8 (sublane) so every
        # row tile is store-aligned (no masked partial stores); the extra
        # columns read zero-padded input and are sliced off at the end.
        Wo_pad = _round_up(Wo, 8)
        if Wo_pad != Wo:
            need_w = (Wo_pad - 1) * s + K
            x_pad = jnp.pad(x_pad, ((0, 0), (0, 0), (0, need_w - Wp), (0, 0)))

        # kw-unfold + W-stride decimation in the wrapper (K x activation bytes
        # in HBM, NOT K*K): the lane axis becomes K*Cin and the kernel only
        # issues dense, contiguous loads.
        cols = [x_pad[:, :, kw: kw + (Wo_pad - 1) * s + 1: s, :]
                for kw in range(K)]
        x_unf = jnp.concatenate(cols, axis=-1)          # [N, Hp, Wo_pad, K*Cin]
        x2d = x_unf.reshape(N, Hp * Wo_pad, K * Cin).astype(self.compute_dtype)

        try:
            out_flat = _fused_conv(x2d, self.w_packed, self.b_packed,
                                   K=K, stride=s, Ho=Ho, Wo=Wo_pad,
                                   single_buffer_consts=True)
        except Exception:
            # Fallback if this Pallas build rejects single-buffered BlockSpecs.
            out_flat = _fused_conv(x2d, self.w_packed, self.b_packed,
                                   K=K, stride=s, Ho=Ho, Wo=Wo_pad,
                                   single_buffer_consts=False)

        out = out_flat.reshape(N, Ho, Wo_pad, self.Cout_pad)[:, :, :Wo, :Cout]
        return jnp.transpose(out, (0, 3, 1, 2)).astype(x.dtype)    # NCHW


# ----------------------------------- main ------------------------------------

if __name__ == "__main__":
    key = jax.random.PRNGKey(0)
    k_x, k_params = jax.random.split(key)

    # Small shapes consistent with the module: N=2, Cin=4, H=W=16, Cout=8, K=3.
    N, Cin, H, W = 2, 4, 16, 16
    Cout, K = 8, 3

    x = jax.random.normal(k_x, (N, Cin, H, W), jnp.float32)

    def reference(layer, xin, stride):
        p = layer.reflection_padding
        xp = jnp.pad(xin, ((0, 0), (0, 0), (p, p), (p, p)), mode="reflect")
        y = lax.conv_general_dilated(
            xp, layer.weight, window_strides=(stride, stride), padding="VALID",
            dimension_numbers=("NCHW", "OIHW", "NCHW"))
        return y + layer.bias.reshape(1, -1, 1, 1)

    # 1) Strict f32 parity, stride 1.
    layer_f32 = ConvLayer(Cin, Cout, K, 1, k_params, compute_dtype=jnp.float32)
    y = jax.block_until_ready(layer_f32(x))
    y_ref = reference(layer_f32, x, 1)
    assert y.shape == y_ref.shape, (y.shape, y_ref.shape)
    assert jnp.allclose(y, y_ref, atol=1e-4, rtol=1e-4), \
        float(jnp.max(jnp.abs(y - y_ref)))

    # 2) Default bf16-operand path (f32 accumulation), looser tolerance.
    layer_bf16 = ConvLayer(Cin, Cout, K, 1, k_params)
    y16 = jax.block_until_ready(layer_bf16(x))
    assert jnp.allclose(y16, y_ref, atol=2e-2, rtol=2e-2), \
        float(jnp.max(jnp.abs(y16 - y_ref)))

    # 3) Strided path (stride 2), strict f32 parity.
    layer_s2 = ConvLayer(Cin, Cout, K, 2, k_params, compute_dtype=jnp.float32)
    y2 = jax.block_until_ready(layer_s2(x))
    y2_ref = reference(layer_s2, x, 2)
    assert y2.shape == y2_ref.shape, (y2.shape, y2_ref.shape)
    assert jnp.allclose(y2, y2_ref, atol=1e-4, rtol=1e-4), \
        float(jnp.max(jnp.abs(y2 - y2_ref)))

    print("KERNEL_OK")
</pallas_src>

<mosaic_0001>
module attributes {stable_mosaic.version = 11 : i64} {
  func.func @_conv_kernel(%arg0: i32, %arg1: i32, %arg2: memref<1x288x12xf32, #tpu.memory_space<vmem>>, %arg3: memref<3x12x128xf32, #tpu.memory_space<vmem>>, %arg4: memref<1x128xf32, #tpu.memory_space<vmem>>, %arg5: memref<1x256x128xf32, #tpu.memory_space<vmem>>) attributes {dimension_semantics = [#tpu.dimension_semantics<parallel>, #tpu.dimension_semantics<parallel>], iteration_bounds = array<i64: 2, 1>, scalar_prefetch = 0 : i64, scratch_operands = 0 : i64, tpu.core_type = #tpu.core_type<tc>, window_params = [{transform_indices = @transform_0, window_bounds = array<i64: 1, 288, 12>}, {pipeline_mode = #tpu.pipeline_mode<synchronous>, transform_indices = @transform_1, window_bounds = array<i64: 3, 12, 128>}, {pipeline_mode = #tpu.pipeline_mode<synchronous>, transform_indices = @transform_2, window_bounds = array<i64: 1, 128>}, {transform_indices = @transform_3, window_bounds = array<i64: 1, 256, 128>}]} {
    %c256_i32 = arith.constant 256 : i32
    %0 = arith.muli %arg1, %c256_i32 : i32
    %c0_i32 = arith.constant 0 : i32
    %1 = arith.addi %0, %c0_i32 : i32
    %2 = tpu.assume_multiple %1, 8 : i32
    %c0 = arith.constant 0 : index
    %3 = arith.index_cast %2 : i32 to index
    %c0_0 = arith.constant 0 : index
    %4 = vector.load %arg2[%c0, %3, %c0_0] : memref<1x288x12xf32, #tpu.memory_space<vmem>>, vector<1x256x12xf32>
    %5 = vector.shape_cast %4 : vector<1x256x12xf32> to vector<256x12xf32>
    %c0_1 = arith.constant 0 : index
    %c0_2 = arith.constant 0 : index
    %c0_3 = arith.constant 0 : index
    %6 = vector.load %arg3[%c0_1, %c0_2, %c0_3] : memref<3x12x128xf32, #tpu.memory_space<vmem>>, vector<1x12x128xf32>
    %7 = vector.shape_cast %6 : vector<1x12x128xf32> to vector<12x128xf32>
    %cst = arith.constant dense<0.000000e+00> : vector<256x128xf32>
    %8 = tpu.matmul %5, %7, %cst {dimension_numbers = #tpu.dot_dimension_numbers<[1], [0], [0], [1], [0, 0, 1, 1], [], []>} : vector<256x12xf32>, vector<12x128xf32>, vector<256x128xf32> -> vector<256x128xf32>
    %c16_i32 = arith.constant 16 : i32
    %9 = arith.addi %0, %c16_i32 : i32
    %10 = tpu.assume_multiple %9, 8 : i32
    %c0_4 = arith.constant 0 : index
    %11 = arith.index_cast %10 : i32 to index
    %c0_5 = arith.constant 0 : index
    %12 = vector.load %arg2[%c0_4, %11, %c0_5] : memref<1x288x12xf32, #tpu.memory_space<vmem>>, vector<1x256x12xf32>
    %13 = vector.shape_cast %12 : vector<1x256x12xf32> to vector<256x12xf32>
    %c1 = arith.constant 1 : index
    %c0_6 = arith.constant 0 : index
    %c0_7 = arith.constant 0 : index
    %14 = vector.load %arg3[%c1, %c0_6, %c0_7] : memref<3x12x128xf32, #tpu.memory_space<vmem>>, vector<1x12x128xf32>
    %15 = vector.shape_cast %14 : vector<1x12x128xf32> to vector<12x128xf32>
    %cst_8 = arith.constant dense<0.000000e+00> : vector<256x128xf32>
    %16 = tpu.matmul %13, %15, %cst_8 {dimension_numbers = #tpu.dot_dimension_numbers<[1], [0], [0], [1], [0, 0, 1, 1], [], []>} : vector<256x12xf32>, vector<12x128xf32>, vector<256x128xf32> -> vector<256x128xf32>
    %17 = arith.addf %8, %16 : vector<256x128xf32>
    %c32_i32 = arith.constant 32 : i32
    %18 = arith.addi %0, %c32_i32 : i32
    %19 = tpu.assume_multiple %18, 8 : i32
    %c0_9 = arith.constant 0 : index
    %20 = arith.index_cast %19 : i32 to index
    %c0_10 = arith.constant 0 : index
    %21 = vector.load %arg2[%c0_9, %20, %c0_10] : memref<1x288x12xf32, #tpu.memory_space<vmem>>, vector<1x256x12xf32>
    %22 = vector.shape_cast %21 : vector<1x256x12xf32> to vector<256x12xf32>
    %c2 = arith.constant 2 : index
    %c0_11 = arith.constant 0 : index
    %c0_12 = arith.constant 0 : index
    %23 = vector.load %arg3[%c2, %c0_11, %c0_12] : memref<3x12x128xf32, #tpu.memory_space<vmem>>, vector<1x12x128xf32>
    %24 = vector.shape_cast %23 : vector<1x12x128xf32> to vector<12x128xf32>
    %cst_13 = arith.constant dense<0.000000e+00> : vector<256x128xf32>
    %25 = tpu.matmul %22, %24, %cst_13 {dimension_numbers = #tpu.dot_dimension_numbers<[1], [0], [0], [1], [0, 0, 1, 1], [], []>} : vector<256x12xf32>, vector<12x128xf32>, vector<256x128xf32> -> vector<256x128xf32>
    %26 = arith.addf %17, %25 : vector<256x128xf32>
    %c0_14 = arith.constant 0 : index
    %c0_15 = arith.constant 0 : index
    %27 = vector.load %arg4[%c0_14, %c0_15] : memref<1x128xf32, #tpu.memory_space<vmem>>, vector<1x128xf32>
    %28 = vector.broadcast %27 : vector<1x128xf32> to vector<256x128xf32>
    %29 = arith.addf %26, %28 : vector<256x128xf32>
    %c0_16 = arith.constant 0 : index
    %c0_17 = arith.constant 0 : index
    %c0_18 = arith.constant 0 : index
    %30 = vector.load %arg5[%c0_16, %c0_17, %c0_18] : memref<1x256x128xf32, #tpu.memory_space<vmem>>, vector<1x256x128xf32>
    %31 = vector.shape_cast %30 : vector<1x256x128xf32> to vector<256x128xf32>
    %32 = vector.shape_cast %29 : vector<256x128xf32> to vector<1x256x128xf32>
    tpu.vector_store %arg5[%c0_16, %c0_17, %c0_18], %32 {strides = array<i32>} : memref<1x256x128xf32, #tpu.memory_space<vmem>>, vector<1x256x128xf32>,
    return
  }
  func.func @transform_0(%arg0: i32, %arg1: i32) -> (i32, i32, i32) {
    %c0_i32 = arith.constant 0 : i32
    %c0_i32_0 = arith.constant 0 : i32
    %c0_i32_1 = arith.constant 0 : i32
    return %arg0, %c0_i32, %c0_i32_0 : i32, i32, i32
  }
  func.func @transform_1(%arg0: i32, %arg1: i32) -> (i32, i32, i32) {
    %c0_i32 = arith.constant 0 : i32
    %c0_i32_0 = arith.constant 0 : i32
    %c0_i32_1 = arith.constant 0 : i32
    %c0_i32_2 = arith.constant 0 : i32
    return %c0_i32, %c0_i32_0, %c0_i32_1 : i32, i32, i32
  }
  func.func @transform_2(%arg0: i32, %arg1: i32) -> (i32, i32) {
    %c0_i32 = arith.constant 0 : i32
    %c0_i32_0 = arith.constant 0 : i32
    %c0_i32_1 = arith.constant 0 : i32
    return %c0_i32, %c0_i32_0 : i32, i32
  }
  func.func @transform_3(%arg0: i32, %arg1: i32) -> (i32, i32, i32) {
    %c0_i32 = arith.constant 0 : i32
    %c0_i32_0 = arith.constant 0 : i32
    return %arg0, %arg1, %c0_i32 : i32, i32, i32
  }
}

module attributes {stable_mosaic.version = 11 : i64} {
  func.func @_conv_kernel(%arg0: i32, %arg1: i32, %arg2: memref<1x288x12xf32, #tpu.memory_space<vmem>>, %arg3: memref<3x12x128xf32, #tpu.memory_space<vmem>>, %arg4: memref<1x128xf32, #tpu.memory_space<vmem>>, %arg5: memref<1x256x128xf32, #tpu.memory_space<vmem>>) attributes {dimension_semantics = [#tpu.dimension_semantics<parallel>, #tpu.dimension_semantics<parallel>], iteration_bounds = array<i64: 2, 1>, scalar_prefetch = 0 : i64, scratch_operands = 0 : i64, tpu.core_type = #tpu.core_type<tc>, window_params = [{transform_indices = @transform_0, window_bounds = array<i64: 1, 288, 12>}, {pipeline_mode = #tpu.pipeline_mode<synchronous>, transform_indices = @transform_1, window_bounds = array<i64: 3, 12, 128>}, {pipeline_mode = #tpu.pipeline_mode<synchronous>, transform_indices = @transform_2, window_bounds = array<i64: 1, 128>}, {transform_indices = @transform_3, window_bounds = array<i64: 1, 256, 128>}]} {
    %c256_i32 = arith.constant 256 : i32
    %0 = arith.muli %arg1, %c256_i32 : i32
    %c0_i32 = arith.constant 0 : i32
    %1 = arith.addi %0, %c0_i32 : i32
    %2 = tpu.assume_multiple %1, 8 : i32
    %c0 = arith.constant 0 : index
    %3 = arith.index_cast %2 : i32 to index
    %c0_0 = arith.constant 0 : index
    %4 = vector.load %arg2[%c0, %3, %c0_0] : memref<1x288x12xf32, #tpu.memory_space<vmem>>, vector<1x256x12xf32>
    %5 = vector.shape_cast %4 : vector<1x256x12xf32> to vector<256x12xf32>
    %c0_1 = arith.constant 0 : index
    %c0_2 = arith.constant 0 : index
    %c0_3 = arith.constant 0 : index
    %6 = vector.load %arg3[%c0_1, %c0_2, %c0_3] : memref<3x12x128xf32, #tpu.memory_space<vmem>>, vector<1x12x128xf32>
    %7 = vector.shape_cast %6 : vector<1x12x128xf32> to vector<12x128xf32>
    %cst = arith.constant dense<0.000000e+00> : vector<256x128xf32>
    %8 = tpu.matmul %5, %7, %cst {dimension_numbers = #tpu.dot_dimension_numbers<[1], [0], [0], [1], [0, 0, 1, 1], [], []>} : vector<256x12xf32>, vector<12x128xf32>, vector<256x128xf32> -> vector<256x128xf32>
    %c16_i32 = arith.constant 16 : i32
    %9 = arith.addi %0, %c16_i32 : i32
    %10 = tpu.assume_multiple %9, 8 : i32
    %c0_4 = arith.constant 0 : index
    %11 = arith.index_cast %10 : i32 to index
    %c0_5 = arith.constant 0 : index
    %12 = vector.load %arg2[%c0_4, %11, %c0_5] : memref<1x288x12xf32, #tpu.memory_space<vmem>>, vector<1x256x12xf32>
    %13 = vector.shape_cast %12 : vector<1x256x12xf32> to vector<256x12xf32>
    %c1 = arith.constant 1 : index
    %c0_6 = arith.constant 0 : index
    %c0_7 = arith.constant 0 : index
    %14 = vector.load %arg3[%c1, %c0_6, %c0_7] : memref<3x12x128xf32, #tpu.memory_space<vmem>>, vector<1x12x128xf32>
    %15 = vector.shape_cast %14 : vector<1x12x128xf32> to vector<12x128xf32>
    %cst_8 = arith.constant dense<0.000000e+00> : vector<256x128xf32>
    %16 = tpu.matmul %13, %15, %cst_8 {dimension_numbers = #tpu.dot_dimension_numbers<[1], [0], [0], [1], [0, 0, 1, 1], [], []>} : vector<256x12xf32>, vector<12x128xf32>, vector<256x128xf32> -> vector<256x128xf32>
    %17 = arith.addf %8, %16 : vector<256x128xf32>
    %c32_i32 = arith.constant 32 : i32
    %18 = arith.addi %0, %c32_i32 : i32
    %19 = tpu.assume_multiple %18, 8 : i32
    %c0_9 = arith.constant 0 : index
    %20 = arith.index_cast %19 : i32 to index
    %c0_10 = arith.constant 0 : index
    %21 = vector.load %arg2[%c0_9, %20, %c0_10] : memref<1x288x12xf32, #tpu.memory_space<vmem>>, vector<1x256x12xf32>
    %22 = vector.shape_cast %21 : vector<1x256x12xf32> to vector<256x12xf32>
    %c2 = arith.constant 2 : index
    %c0_11 = arith.constant 0 : index
    %c0_12 = arith.constant 0 : index
    %23 = vector.load %arg3[%c2, %c0_11, %c0_12] : memref<3x12x128xf32, #tpu.memory_space<vmem>>, vector<1x12x128xf32>
    %24 = vector.shape_cast %23 : vector<1x12x128xf32> to vector<12x128xf32>
    %cst_13 = arith.constant dense<0.000000e+00> : vector<256x128xf32>
    %25 = tpu.matmul %22, %24, %cst_13 {dimension_numbers = #tpu.dot_dimension_numbers<[1], [0], [0], [1], [0, 0, 1, 1], [], []>} : vector<256x12xf32>, vector<12x128xf32>, vector<256x128xf32> -> vector<256x128xf32>
    %26 = arith.addf %17, %25 : vector<256x128xf32>
    %c0_14 = arith.constant 0 : index
    %c0_15 = arith.constant 0 : index
    %27 = vector.load %arg4[%c0_14, %c0_15] : memref<1x128xf32, #tpu.memory_space<vmem>>, vector<1x128xf32>
    %28 = vector.broadcast %27 : vector<1x128xf32> to vector<256x128xf32>
    %29 = arith.addf %26, %28 : vector<256x128xf32>
    %c0_16 = arith.constant 0 : index
    %c0_17 = arith.constant 0 : index
    %c0_18 = arith.constant 0 : index
    %30 = vector.load %arg5[%c0_16, %c0_17, %c0_18] : memref<1x256x128xf32, #tpu.memory_space<vmem>>, vector<1x256x128xf32>
    %31 = vector.shape_cast %30 : vector<1x256x128xf32> to vector<256x128xf32>
    %32 = vector.shape_cast %29 : vector<256x128xf32> to vector<1x256x128xf32>
    tpu.vector_store %arg5[%c0_16, %c0_17, %c0_18], %32 {strides = array<i32>} : memref<1x256x128xf32, #tpu.memory_space<vmem>>, vector<1x256x128xf32>,
    return
  }
  func.func @transform_0(%arg0: i32, %arg1: i32) -> (i32, i32, i32) {
    %c0_i32 = arith.constant 0 : i32
    %c0_i32_0 = arith.constant 0 : i32
    %c0_i32_1 = arith.constant 0 : i32
    return %arg0, %c0_i32, %c0_i32_0 : i32, i32, i32
  }
  func.func @transform_1(%arg0: i32, %arg1: i32) -> (i32, i32, i32) {
    %c0_i32 = arith.constant 0 : i32
    %c0_i32_0 = arith.constant 0 : i32
    %c0_i32_1 = arith.constant 0 : i32
    %c0_i32_2 = arith.constant 0 : i32
    return %c0_i32, %c0_i32_0, %c0_i32_1 : i32, i32, i32
  }
  func.func @transform_2(%arg0: i32, %arg1: i32) -> (i32, i32) {
    %c0_i32 = arith.constant 0 : i32
    %c0_i32_0 = arith.constant 0 : i32
    %c0_i32_1 = arith.constant 0 : i32
    return %c0_i32, %c0_i32_0 : i32, i32
  }
  func.func @transform_3(%arg0: i32, %arg1: i32) -> (i32, i32, i32) {
    %c0_i32 = arith.constant 0 : i32
    %c0_i32_0 = arith.constant 0 : i32
    return %arg0, %arg1, %c0_i32 : i32, i32, i32
  }
}

</mosaic_0001>

<bundles_post_ra>
// kernel: tpu_custom_call.1
= control target key start
LH: loop header
LB: loop body
LE: loop exit
PB: predicated region body
PF: predicated region fallthrough
CT: control target
= control target key end

     0   :  { %8 = vsyncpa [#allocation3], 0  ;;  %s1905_s0 = inlined_call_operand.vmem [shape: f32[2,288,12], index: 0, kind: input, shape index: {}]   ;;  %s1906_s1 = inlined_call_operand.vmem [shape: f32[3,12,128], index: 1, kind: input, shape index: {}]   ;;  %s1907_s2 = inlined_call_operand.vmem [shape: f32[1,128], index: 2, kind: input, shape index: {}]   ;;  %s1908_s3 = inlined_call_operand.hbm [shape: f32[2,256,128], index: 3, kind: output, shape index: {}]  }
   0x1   :  { %10 = vsyncpa [#allocation3 + $0x1], 0  ;;  %s1478_s12 = smov 0   ;;  %s1480_s13 = smov 0  }
   0x2   :  { %s1482_s14 = smov 0   ;;  %s1484_s15 = smov 0  }
   0x3   :  { %s1486_s16 = smov 0   ;;  %s1488_s17 = smov 0  }
   0x4 LB: > { %s1131_s18 = sadd.s32 4294967295, %s1454_s17   ;;  %s1132_s19 = sadd.s32 4294967294, %s1454_s17   ;;  %s1454_s17 = sphi %s1488_s17, %s16_s17   ;;  %s1450_s16 = sphi %s1486_s16, %s1915_s16   ;;  %s1446_s15 = sphi %s1484_s15, %s1914_s15   ;;  %s1442_s14 = sphi %s1482_s14, %s1913_s14   ;;  %s1438_s13 = sphi %s1480_s13, %s1912_s13   ;;  %s1434_s12 = sphi %s1478_s12, %s1911_s12  }
   0x5   : > { %s28_s20 = sadd.s32 1, %s1450_s16  ;;  %s105_s21 = sadd.s32 1, %s1442_s14 }
   0x6   : > { %p30_p0 = scmp.ge.s32.totalorder %s28_s20, 2  ;;  %p115_p1 = scmp.ne.s32.totalorder %s1442_s14, %s1438_s13 }
   0x7   : > { %p116_p2 = scmp.eq.s32.totalorder %s1131_s18, 1  ;;  %p121_p3 = scmp.ne.s32.totalorder %s1438_s13, %s1434_s12 }
   0x8   : > { %s1917_s20 = smov (%p30_p0, %s28_s20), 0  ;;  %p122_p5 = scmp.eq.s32.totalorder %s1132_s19, 1 }
   0x9   : > { %p1518_p4 = por %p116_p2, %p115_p1  ;;  %s100_s23 = ssub.s32 %s1450_s16, %s1917_s20 }
   0xa   : > { %p1135_p6 = scmp.ge.s32.totalorder %s1454_s17, 1  ;;  %p103_p7 = scmp.eq.s32.totalorder %s100_s23, 0 }
   0xb   : > { %p1525_p8 = por %p122_p5, %p121_p3  ;;  %p154_p9 = scmp.lt.s32.totalorder %s1454_s17, 3 }
   0xc   : > { %s1531_s25 = scalar_select %p103_p7, %s1442_s14, %s105_s21  }
   0xd   : > { %p155_p10 = pnand %p1135_p6, %p154_p9 }
   0xe   : > { %p178_p11 = scmp.lt.s32.totalorder (!%p155_p10), %s1446_s15, 1  ;;  %s175_s26 = sand.u32 (!%p155_p10), 1, %s1438_s13  }
   0xf   : > { %158 = sbr.rel (%p155_p10) target bundleno = 352 (0x160), region = 32  ;;  %s1136_s27 = sshll.u32 (!%p155_p10), %s175_s26, 8 }
  0x10   : > { %s1712_s30 = scalar_lea.vmem (!%p155_p10), [#allocation2], %s1136_s27  ;;  %s1310_s4 = sshll.u32 (!%p155_p10), %s1446_s15, 8 }
  0x11   : > { %s1046_s7 = scalar_lea.hbm (!%p155_p10), %s1908_s3, %s1310_s4  ;;  %s1033_s9 = scalar_lea.sflag (!%p155_p10), [#allocation3], %s175_s26 }
  0x12   : > { %s1049_s8 = sshll.u32 (!%p155_p10), %s1046_s7, 4  ;;  %s1396_s21 = scalar_lea.hbm (!%p155_p10), %s1908_s3, 512  ;;  %s1050_s8 = int_to_ptr.hbm [resolvable:$true] %s1049_s8 }
  0x13   : > { %s1390_s10 = sshra.s32 (!%p155_p10), %s1050_s8, 4  ;;  %s1391_s10 = int_to_ptr.hbm [resolvable:$true] %s1390_s10 }
  0x14   : > { %v1171_v0 = vld [vmem:[%s1906_s1 + $0x18] sm:$0xf]  ;;  %vm354_vm0 = vcmask 1043456   ;;  %v1271_v1 = vld [vmem:[%s1906_s1 + $0x28] sm:$0xf]  ;;  %v1170_v2 = vld [vmem:[%s1906_s1 + $0x10] sm:$0xff]  ;;  %p1397_p1 = scmp.lt.s32.totalorder %s1391_s10, %s1908_s3 }
  0x15   : > { %1311 = vmatpush.msk.msra.mxu3 %vm354_vm0, %v1171_v0  ;;  %1272 = vmatpush.msk.msra.mxu2 %vm354_vm0, %v1271_v1  ;;  %v1270_v3 = vld [vmem:[%s1906_s1 + $0x20] sm:$0xff]  ;;  %v219_v4 = vld [vmem:[%s1906_s1 + $0x8] sm:$0xf]  ;;  %s179_s11 = scalar_select %p178_p11, %s1446_s15, 1  ;;  %vm257_vm1 = vcmask 97280  }
  0x16   : > { %1172 = vmatpush.msk.msra.mxu0 %vm354_vm0, %v1171_v0  ;;  %1205 = vmatpush.msk.msra.mxu1 %vm354_vm0, %v219_v4  ;;  %v218_v5 = vld [vmem:[%s1906_s1] sm:$0xff]  ;;  %s1047_s15 = sshll.u32 %s1712_s30, 4  ;;  %s1048_s15 = int_to_ptr.vmem [resolvable:$true] %s1047_s15 }
  0x17   : > { %1312 = vmatpush.msra.mxu3 %v1170_v2  ;;  %834 = vmatpush.msra.mxu2 %v1270_v3  ;;  %s1317_s18 = smul.u32 288, %s179_s11  ;;  %v1706_v40 = vld [vmem:[%s1907_s2] ss:$0 sm:$0xff]  ;;  %s1392_s11 = scalar_lea.hbm %s1391_s10, 256 }
  0x18   : > { %373 = vmatpush.msra.mxu0 %v1170_v2  ;;  %585 = vmatpush.msra.mxu1 %v218_v5  ;;  %p1393_p12 = scmp.ne.s32.totalorder %s1391_s10, %s1392_s11  ;;  %p1398_p2 = scmp.lt.s32.totalorder %s1396_s21, %s1392_s11 }
  0x19   : > { %1313 = vmatpush.msk.msrb.mxu3 %vm354_vm0, %v219_v4  ;;  %s1561_s23 = scalar_lea.vmem %s1905_s0, %s1317_s18 }
  0x1a   : > { %v1564_v6 = vld [vmem:[%s1561_s23 + $0xd0] sm:$0xff]  ;;  %v1238_v7 = vld [vmem:[%s1561_s23 + $0x20] sm:$0xff]  ;;  %v1576_v10 = vld [vmem:[%s1561_s23 + $0xd8] sm:$0xff]  ;;  %p1394_p13 = pnand %p1393_p12, %p1518_p4  ;;  %p1399_p3 = por %p1398_p2, %p1397_p1 }
  0x1b   : > { %1314 = vmatpush.msrb.mxu3 %v218_v5  ;;  %v1138_v8 = vld [vmem:[%s1561_s23 + $0x10] sm:$0xff]  ;;  %1273 = vmatmul.msk.f32.vlgmr.msra.gmra.mxu2 %vm257_vm1, %v1238_v7  ;;  %v186_v9 = vld [vmem:[%s1561_s23] sm:$0xff]  ;;  %v1239_v11 = vld [vmem:[%s1561_s23 + $0x28] sm:$0xff] }
  0x1c   : > { %1197 = vmatmul.msk.f32.vlgmr.msra.gmra.mxu3 %vm257_vm1, %v1564_v6  ;;  %1173 = vmatmul.msk.f32.vlgmr.msra.gmra.mxu0 %vm257_vm1, %v1138_v8  ;;  %v1139_v12 = vld [vmem:[%s1561_s23 + $0x18] sm:$0xff]  ;;  %v187_v13 = vld [vmem:[%s1561_s23 + $0x8] sm:$0xff]  ;;  %v1587_v14 = vld [vmem:[%s1561_s23 + $0xe0] sm:$0xff]  ;;  %p1395_p0 = pneg %p1394_p13 }
  0x1d   : > { %1206 = vmatmul.msk.f32.vlgmr.msra.gmra.mxu1 %vm257_vm1, %v186_v9  ;;  %1315 = vmatpush.msk.msra.mxu3 %vm354_vm0, %v1271_v1  ;;  %v1240_v15 = vld [vmem:[%s1561_s23 + $0x30] sm:$0xff]  ;;  %v1596_v16 = vld [vmem:[%s1561_s23 + $0xe8] sm:$0xff]  ;;  %v1241_v17 = vld [vmem:[%s1561_s23 + $0x38] sm:$0xff] }
  0x1e   : > { %v1605_v18 = vld [vmem:[%s1561_s23 + $0xf0] sm:$0xff]  ;;  %v1242_v19 = vld [vmem:[%s1561_s23 + $0x40] sm:$0xff]  ;;  %v1614_v20 = vld [vmem:[%s1561_s23 + $0xf8] sm:$0xff]  ;;  %p1400_p5 = pnand %p1399_p3, %p1395_p0 }
  0x1f   : > { %1316 = vmatpush.msra.mxu3 %v1270_v3  ;;  %v1243_v21 = vld [vmem:[%s1561_s23 + $0x48] sm:$0xff]  ;;  %v1623_v22 = vld [vmem:[%s1561_s23 + $0x100] sm:$0xff]  ;;  %v1244_v23 = vld [vmem:[%s1561_s23 + $0x50] sm:$0xff] }
  0x20   : > { %v1632_v24 = vld [vmem:[%s1561_s23 + $0x108] sm:$0xff]  ;;  %v1245_v25 = vld [vmem:[%s1561_s23 + $0x58] sm:$0xff]  ;;  %v1641_v26 = vld [vmem:[%s1561_s23 + $0xc0] sm:$0xff] }
  0x21   : > { %v1246_v27 = vld [vmem:[%s1561_s23 + $0x60] sm:$0xff]  ;;  %v1650_v28 = vld [vmem:[%s1561_s23 + $0xc8] sm:$0xff]  ;;  %v1248_v30 = vld [vmem:[%s1561_s23 + $0x70] sm:$0xff] }
  0x22   : > { %v1247_v29 = vld [vmem:[%s1561_s23 + $0x68] sm:$0xff]  ;;  %v1249_v31 = vld [vmem:[%s1561_s23 + $0x78] sm:$0xff]  ;;  %v1250_v32 = vld [vmem:[%s1561_s23 + $0x80] sm:$0xff] }
  0x23   : > { %1274 = vmatmul.msk.f32.gmra.mxu2 %vm257_vm1, %v1239_v11  ;;  %v1251_v33 = vld [vmem:[%s1561_s23 + $0x88] sm:$0xff]  ;;  %v1252_v34 = vld [vmem:[%s1561_s23 + $0x90] sm:$0xff]  ;;  %v1253_v35 = vld [vmem:[%s1561_s23 + $0x98] sm:$0xff] }
  0x24   : > { %1198 = vmatmul.msk.f32.gmra.mxu3 %vm257_vm1, %v1576_v10  ;;  %1174 = vmatmul.msk.f32.gmra.mxu0 %vm257_vm1, %v1139_v12  ;;  %v1254_v36 = vld [vmem:[%s1561_s23 + $0xa0] sm:$0xff]  ;;  %v1255_v44 = vld [vmem:[%s1561_s23 + $0xa8] sm:$0xff]  ;;  %v1256_v52 = vld [vmem:[%s1561_s23 + $0xb0] sm:$0xff] }
  0x25   : > { %1207 = vmatmul.msk.f32.gmra.mxu1 %vm257_vm1, %v187_v13  ;;  %v1257_v60 = vld [vmem:[%s1561_s23 + $0xb8] sm:$0xff] }
  0x2b   : > { %1275 = vmatmul.msk.f32.gmra.mxu2 %vm257_vm1, %v1240_v15 }
  0x2c   : > { %1199 = vmatmul.msk.f32.gmra.mxu3 %vm257_vm1, %v1587_v14  ;;  %1175 = vmatmul.msk.f32.gmra.mxu0 %vm257_vm1, %v1238_v7 }
  0x2d   : > { %1208 = vmatmul.msk.f32.gmra.mxu1 %vm257_vm1, %v1138_v8 }
  0x33   : > { %1276 = vmatmul.msk.f32.gmra.mxu2 %vm257_vm1, %v1241_v17 }
  0x34   : > { %1200 = vmatmul.msk.f32.gmra.mxu3 %vm257_vm1, %v1596_v16  ;;  %1176 = vmatmul.msk.f32.gmra.mxu0 %vm257_vm1, %v1239_v11 }
  0x35   : > { %1209 = vmatmul.msk.f32.gmra.mxu1 %vm257_vm1, %v1139_v12 }
  0x3b   : > { %1277 = vmatmul.msk.f32.gmra.mxu2 %vm257_vm1, %v1242_v19 }
  0x3c   : > { %1201 = vmatmul.msk.f32.gmra.mxu3 %vm257_vm1, %v1605_v18  ;;  %1177 = vmatmul.msk.f32.gmra.mxu0 %vm257_vm1, %v1240_v15 }
  0x3d   : > { %1210 = vmatmul.msk.f32.gmra.mxu1 %vm257_vm1, %v1238_v7 }
  0x43   : > { %1278 = vmatmul.msk.f32.gmra.mxu2 %vm257_vm1, %v1243_v21 }
  0x44   : > { %1202 = vmatmul.msk.f32.gmra.mxu3 %vm257_vm1, %v1614_v20  ;;  %1178 = vmatmul.msk.f32.gmra.mxu0 %vm257_vm1, %v1241_v17 }
  0x45   : > { %1211 = vmatmul.msk.f32.gmra.mxu1 %vm257_vm1, %v1239_v11 }
  0x4b   : > { %1279 = vmatmul.msk.f32.gmra.mxu2 %vm257_vm1, %v1244_v23 }
  0x4c   : > { %1203 = vmatmul.msk.f32.gmra.mxu3 %vm257_vm1, %v1623_v22  ;;  %1179 = vmatmul.msk.f32.gmra.mxu0 %vm257_vm1, %v1242_v19 }
  0x4d   : > { %1212 = vmatmul.msk.f32.gmra.mxu1 %vm257_vm1, %v1240_v15 }
  0x53   : > { %1280 = vmatmul.msk.f32.gmra.mxu2 %vm257_vm1, %v1245_v25 }
  0x54   : > { %1204 = vmatmul.msk.f32.gmra.mxu3 %vm257_vm1, %v1632_v24  ;;  %1180 = vmatmul.msk.f32.gmra.mxu0 %vm257_vm1, %v1243_v21 }
  0x55   : > { %1213 = vmatmul.msk.f32.gmra.mxu1 %vm257_vm1, %v1241_v17 }
  0x5b   : > { %1281 = vmatmul.msk.f32.gmra.mxu2 %vm257_vm1, %v1246_v27 }
  0x5c   : > { %1230 = vmatmul.msk.f32.vlgmr.msrb.gmra.mxu3 %vm257_vm1, %v1641_v26  ;;  %1181 = vmatmul.msk.f32.gmra.mxu0 %vm257_vm1, %v1244_v23 }
  0x5d   : > { %1214 = vmatmul.msk.f32.gmra.mxu1 %vm257_vm1, %v1242_v19 }
  0x63   : > { %1282 = vmatmul.msk.f32.gmra.mxu2 %vm257_vm1, %v1247_v29 }
  0x64   : > { %1231 = vmatmul.msk.f32.gmra.mxu3 %vm257_vm1, %v1650_v28  ;;  %1182 = vmatmul.msk.f32.gmra.mxu0 %vm257_vm1, %v1245_v25 }
  0x65   : > { %1215 = vmatmul.msk.f32.gmra.mxu1 %vm257_vm1, %v1243_v21 }
  0x6b   : > { %1283 = vmatmul.msk.f32.gmra.mxu2 %vm257_vm1, %v1248_v30 }
  0x6c   : > { %1232 = vmatmul.msk.f32.gmra.mxu3 %vm257_vm1, %v1564_v6  ;;  %1183 = vmatmul.msk.f32.gmra.mxu0 %vm257_vm1, %v1246_v27 }
  0x6d   : > { %1216 = vmatmul.msk.f32.gmra.mxu1 %vm257_vm1, %v1244_v23 }
  0x73   : > { %1284 = vmatmul.msk.f32.gmra.mxu2 %vm257_vm1, %v1249_v31 }
  0x74   : > { %1233 = vmatmul.msk.f32.gmra.mxu3 %vm257_vm1, %v1576_v10  ;;  %1184 = vmatmul.msk.f32.gmra.mxu0 %vm257_vm1, %v1247_v29 }
  0x75   : > { %1217 = vmatmul.msk.f32.gmra.mxu1 %vm257_vm1, %v1245_v25 }
  0x7b   : > { %1285 = vmatmul.msk.f32.gmra.mxu2 %vm257_vm1, %v1250_v32 }
  0x7c   : > { %1234 = vmatmul.msk.f32.gmra.mxu3 %vm257_vm1, %v1587_v14  ;;  %1185 = vmatmul.msk.f32.gmra.mxu0 %vm257_vm1, %v1248_v30 }
  0x7d   : > { %1218 = vmatmul.msk.f32.gmra.mxu1 %vm257_vm1, %v1246_v27 }
  0x83   : > { %1286 = vmatmul.msk.f32.gmra.mxu2 %vm257_vm1, %v1251_v33 }
  0x84   : > { %1235 = vmatmul.msk.f32.gmra.mxu3 %vm257_vm1, %v1596_v16  ;;  %1186 = vmatmul.msk.f32.gmra.mxu0 %vm257_vm1, %v1249_v31 }
  0x85   : > { %1219 = vmatmul.msk.f32.gmra.mxu1 %vm257_vm1, %v1247_v29 }
  0x8b   : > { %1287 = vmatmul.msk.f32.gmra.mxu2 %vm257_vm1, %v1252_v34 }
  0x8c   : > { %1236 = vmatmul.msk.f32.gmra.mxu3 %vm257_vm1, %v1605_v18  ;;  %1187 = vmatmul.msk.f32.gmra.mxu0 %vm257_vm1, %v1250_v32 }
  0x8d   : > { %1220 = vmatmul.msk.f32.gmra.mxu1 %vm257_vm1, %v1248_v30  ;;  %v1269_v30 = vld [vmem:[%s1561_s23 + $0x118] sm:$0xff] }
  0x93   : > { %1288 = vmatmul.msk.f32.gmra.mxu2 %vm257_vm1, %v1253_v35 }
  0x94   : > { %1237 = vmatmul.msk.f32.gmra.mxu3 %vm257_vm1, %v1614_v20  ;;  %1188 = vmatmul.msk.f32.gmra.mxu0 %vm257_vm1, %v1251_v33 }
  0x95   : > { %1221 = vmatmul.msk.f32.gmra.mxu1 %vm257_vm1, %v1249_v31 }
  0x99   : > { %v375_v37 = vpop.f32.mrf.mxu0 }
  0x9a   : > { %v587_v38 = vpop.f32.mrf.mxu1 }
  0x9b   : > { %1289 = vmatmul.msk.f32.gmra.mxu2 %vm257_vm1, %v1254_v36  ;;  %v588_v39 = vadd.f32 %v587_v38, %v375_v37 }
  0x9c   : > { %1297 = vmatmul.msk.f32.vlgmr.msra.gmra.mxu3 %vm257_vm1, %v1587_v14  ;;  %1189 = vmatmul.msk.f32.gmra.mxu0 %vm257_vm1, %v1252_v34 }
  0x9d   : > { %1222 = vmatmul.msk.f32.gmra.mxu1 %vm257_vm1, %v1250_v32 }
  0x9e   : > { %v836_v42 = vpop.f32.mrf.mxu2 }
  0x9f   : > { %v1708_v41 = vpop.f32.mrf.mxu3  ;;  %v932_v43 = vadd.f32 %v836_v42, %v588_v39 }
  0xa1   : > { %v968_v45 = vadd.f32 %v1706_v40, %v932_v43  ;;  %v378_v46 = vpop.f32.mrf.mxu0 }
  0xa2   : > { %v590_v47 = vpop.f32.mrf.mxu1 }
  0xa3   : > { %1000 = vst [vmem:[%s1712_s30] sm:$0xff] %v968_v45  ;;  %1290 = vmatmul.msk.f32.gmra.mxu2 %vm257_vm1, %v1255_v44  ;;  %v591_v48 = vadd.f32 %v590_v47, %v378_v46 }
  0xa4   : > { %1298 = vmatmul.msk.f32.gmra.mxu3 %vm257_vm1, %v1596_v16  ;;  %1190 = vmatmul.msk.f32.gmra.mxu0 %vm257_vm1, %v1253_v35 }
  0xa5   : > { %1223 = vmatmul.msk.f32.gmra.mxu1 %vm257_vm1, %v1251_v33 }
  0xa6   : > { %v839_v50 = vpop.f32.mrf.mxu2 }
  0xa7   : > { %v1720_v49 = vpop.f32.mrf.mxu3  ;;  %v933_v51 = vadd.f32 %v839_v50, %v591_v48 }
  0xa9   : > { %v969_v53 = vadd.f32 %v1706_v40, %v933_v51  ;;  %v381_v54 = vpop.f32.mrf.mxu0 }
  0xaa   : > { %v593_v55 = vpop.f32.mrf.mxu1 }
  0xab   : > { %1001 = vst [vmem:[%s1712_s30 + $0x8] sm:$0xff] %v969_v53  ;;  %1291 = vmatmul.msk.f32.gmra.mxu2 %vm257_vm1, %v1256_v52  ;;  %v594_v56 = vadd.f32 %v593_v55, %v381_v54 }
  0xac   : > { %1299 = vmatmul.msk.f32.gmra.mxu3 %vm257_vm1, %v1605_v18  ;;  %1191 = vmatmul.msk.f32.gmra.mxu0 %vm257_vm1, %v1254_v36 }
  0xad   : > { %1224 = vmatmul.msk.f32.gmra.mxu1 %vm257_vm1, %v1252_v34 }
  0xae   : > { %v842_v58 = vpop.f32.mrf.mxu2 }
  0xaf   : > { %v1730_v57 = vpop.f32.mrf.mxu3  ;;  %v934_v59 = vadd.f32 %v842_v58, %v594_v56 }
  0xb1   : > { %v970_v61 = vadd.f32 %v1706_v40, %v934_v59  ;;  %v384_v62 = vpop.f32.mrf.mxu0 }
  0xb2   : > { %v596_v63 = vpop.f32.mrf.mxu1 }
  0xb3   : > { %1002 = vst [vmem:[%s1712_s30 + $0x10] sm:$0xff] %v970_v61  ;;  %1292 = vmatmul.msk.f32.gmra.mxu2 %vm257_vm1, %v1257_v60  ;;  %v597_v0 = vadd.f32 %v596_v63, %v384_v62 }
  0xb4   : > { %1300 = vmatmul.msk.f32.gmra.mxu3 %vm257_vm1, %v1614_v20  ;;  %1192 = vmatmul.msk.f32.gmra.mxu0 %vm257_vm1, %v1255_v44  ;;  %v1268_v20 = vld [vmem:[%s1561_s23 + $0x110] sm:$0xff] }
  0xb5   : > { %1225 = vmatmul.msk.f32.gmra.mxu1 %vm257_vm1, %v1253_v35 }
  0xb6   : > { %v845_v2 = vpop.f32.mrf.mxu2 }
  0xb7   : > { %v1740_v1 = vpop.f32.mrf.mxu3  ;;  %v935_v3 = vadd.f32 %v845_v2, %v597_v0 }
  0xb9   : > { %v971_v4 = vadd.f32 %v1706_v40, %v935_v3  ;;  %v387_v5 = vpop.f32.mrf.mxu0 }
  0xba   : > { %v599_v7 = vpop.f32.mrf.mxu1 }
  0xbb   : > { %1003 = vst [vmem:[%s1712_s30 + $0x18] sm:$0xff] %v971_v4  ;;  %1293 = vmatmul.msk.f32.gmra.mxu2 %vm257_vm1, %v1641_v26  ;;  %v600_v8 = vadd.f32 %v599_v7, %v387_v5 }
  0xbc   : > { %1301 = vmatmul.msk.f32.gmra.mxu3 %vm257_vm1, %v1623_v22  ;;  %1193 = vmatmul.msk.f32.gmra.mxu0 %vm257_vm1, %v1256_v52 }
  0xbd   : > { %1226 = vmatmul.msk.f32.gmra.mxu1 %vm257_vm1, %v1254_v36 }
  0xbe   : > { %v848_v11 = vpop.f32.mrf.mxu2 }
  0xbf   : > { %v1750_v9 = vpop.f32.mrf.mxu3  ;;  %v936_v12 = vadd.f32 %v848_v11, %v600_v8 }
  0xc1   : > { %v972_v13 = vadd.f32 %v1706_v40, %v936_v12  ;;  %v390_v14 = vpop.f32.mrf.mxu0 }
  0xc2   : > { %v602_v15 = vpop.f32.mrf.mxu1 }
  0xc3   : > { %1004 = vst [vmem:[%s1712_s30 + $0x20] sm:$0xff] %v972_v13  ;;  %1294 = vmatmul.msk.f32.gmra.mxu2 %vm257_vm1, %v1650_v28  ;;  %v603_v16 = vadd.f32 %v602_v15, %v390_v14 }
  0xc4   : > { %1302 = vmatmul.msk.f32.gmra.mxu3 %vm257_vm1, %v1632_v24  ;;  %1194 = vmatmul.msk.f32.gmra.mxu0 %vm257_vm1, %v1257_v60 }
  0xc5   : > { %1227 = vmatmul.msk.f32.gmra.mxu1 %vm257_vm1, %v1255_v44 }
  0xc6   : > { %v851_v18 = vpop.f32.mrf.mxu2 }
  0xc7   : > { %v1760_v17 = vpop.f32.mrf.mxu3  ;;  %v937_v19 = vadd.f32 %v851_v18, %v603_v16 }
  0xc9   : > { %v973_v21 = vadd.f32 %v1706_v40, %v937_v19  ;;  %v393_v22 = vpop.f32.mrf.mxu0 }
  0xca   : > { %v605_v23 = vpop.f32.mrf.mxu1 }
  0xcb   : > { %1005 = vst [vmem:[%s1712_s30 + $0x28] sm:$0xff] %v973_v21  ;;  %1295 = vmatmul.msk.f32.gmra.mxu2 %vm257_vm1, %v1564_v6  ;;  %v606_v24 = vadd.f32 %v605_v23, %v393_v22 }
  0xcc   : > { %1303 = vmatmul.msk.f32.gmra.mxu3 %vm257_vm1, %v1268_v20  ;;  %1195 = vmatmul.msk.f32.gmra.mxu0 %vm257_vm1, %v1641_v26 }
  0xcd   : > { %1228 = vmatmul.msk.f32.gmra.mxu1 %vm257_vm1, %v1256_v52 }
  0xce   : > { %v854_v27 = vpop.f32.mrf.mxu2 }
  0xcf   : > { %v1771_v25 = vpop.f32.mrf.mxu3  ;;  %v938_v29 = vadd.f32 %v854_v27, %v606_v24 }
  0xd1   : > { %v974_v31 = vadd.f32 %v1706_v40, %v938_v29  ;;  %v396_v32 = vpop.f32.mrf.mxu0 }
  0xd2   : > { %v608_v33 = vpop.f32.mrf.mxu1 }
  0xd3   : > { %1006 = vst [vmem:[%s1712_s30 + $0x30] sm:$0xff] %v974_v31  ;;  %1296 = vmatmul.msk.f32.gmra.mxu2 %vm257_vm1, %v1576_v10  ;;  %v609_v6 = vadd.f32 %v608_v33, %v396_v32 }
  0xd4   : > { %1304 = vmatmul.msk.f32.gmra.mxu3 %vm257_vm1, %v1269_v30  ;;  %1196 = vmatmul.msk.f32.gmra.mxu0 %vm257_vm1, %v1650_v28 }
  0xd5   : > { %1229 = vmatmul.msk.f32.gmra.mxu1 %vm257_vm1, %v1257_v60 }
  0xd6   : > { %v857_v34 = vpop.f32.mrf.mxu2 }
  0xd7   : > { %v1782_v26 = vpop.f32.mrf.mxu3  ;;  %v939_v35 = vadd.f32 %v857_v34, %v609_v6 }
  0xd9   : > { %v975_v36 = vadd.f32 %v1706_v40, %v939_v35  ;;  %v399_v37 = vpop.f32.mrf.mxu0 }
  0xda   : > { %v611_v38 = vpop.f32.mrf.mxu1 }
  0xdb   : > { %1007 = vst [vmem:[%s1712_s30 + $0x38] sm:$0xff] %v975_v36  ;;  %v612_v10 = vadd.f32 %v611_v38, %v399_v37 }
  0xde   : > { %v860_v42 = vpop.f32.mrf.mxu2 }
  0xdf   : > { %v1786_v39 = vpop.f32.mrf.mxu3  ;;  %v940_v43 = vadd.f32 %v860_v42, %v612_v10 }
  0xe1   : > { %v976_v28 = vadd.f32 %v1706_v40, %v940_v43  ;;  %v402_v44 = vpop.f32.mrf.mxu0  ;;  %v660_v43 = vadd.f32 %v1786_v39, %v1708_v41 }
  0xe2   : > { %v614_v45 = vpop.f32.mrf.mxu1 }
  0xe3   : > { %1008 = vst [vmem:[%s1712_s30 + $0x40] sm:$0xff] %v976_v28  ;;  %v615_v46 = vadd.f32 %v614_v45, %v402_v44 }
  0xe6   : > { %v863_v48 = vpop.f32.mrf.mxu2 }
  0xe7   : > { %v1790_v47 = vpop.f32.mrf.mxu3  ;;  %v941_v50 = vadd.f32 %v863_v48, %v615_v46 }
  0xe9   : > { %v977_v51 = vadd.f32 %v1706_v40, %v941_v50  ;;  %v405_v52 = vpop.f32.mrf.mxu0 }
  0xea   : > { %v617_v53 = vpop.f32.mrf.mxu1 }
  0xeb   : > { %1009 = vst [vmem:[%s1712_s30 + $0x48] sm:$0xff] %v977_v51  ;;  %v618_v54 = vadd.f32 %v617_v53, %v405_v52 }
  0xee   : > { %v866_v56 = vpop.f32.mrf.mxu2 }
  0xef   : > { %v1794_v55 = vpop.f32.mrf.mxu3  ;;  %v942_v58 = vadd.f32 %v866_v56, %v618_v54  ;;  %v663_v54 = vadd.f32 %v1790_v47, %v1720_v49 }
  0xf1   : > { %v978_v59 = vadd.f32 %v1706_v40, %v942_v58  ;;  %v408_v60 = vpop.f32.mrf.mxu0 }
  0xf2   : > { %v620_v61 = vpop.f32.mrf.mxu1 }
  0xf3   : > { %1010 = vst [vmem:[%s1712_s30 + $0x50] sm:$0xff] %v978_v59  ;;  %v621_v62 = vadd.f32 %v620_v61, %v408_v60 }
  0xf6   : > { %v869_v0 = vpop.f32.mrf.mxu2 }
  0xf7   : > { %v1798_v63 = vpop.f32.mrf.mxu3  ;;  %v943_v2 = vadd.f32 %v869_v0, %v621_v62 }
  0xf9   : > { %v979_v3 = vadd.f32 %v1706_v40, %v943_v2  ;;  %v411_v4 = vpop.f32.mrf.mxu0  ;;  %v666_v2 = vadd.f32 %v1794_v55, %v1730_v57 }
  0xfa   : > { %v623_v5 = vpop.f32.mrf.mxu1 }
  0xfb   : > { %1011 = vst [vmem:[%s1712_s30 + $0x58] sm:$0xff] %v979_v3  ;;  %v624_v7 = vadd.f32 %v623_v5, %v411_v4 }
  0xfe   : > { %v872_v11 = vpop.f32.mrf.mxu2 }
  0xff   : > { %v1802_v8 = vpop.f32.mrf.mxu3  ;;  %v944_v12 = vadd.f32 %v872_v11, %v624_v7 }
 0x101   : > { %v980_v13 = vadd.f32 %v1706_v40, %v944_v12  ;;  %v414_v14 = vpop.f32.mrf.mxu0 }
 0x102   : > { %v626_v15 = vpop.f32.mrf.mxu1 }
 0x103   : > { %1012 = vst [vmem:[%s1712_s30 + $0x60] sm:$0xff] %v980_v13  ;;  %v627_v16 = vadd.f32 %v626_v15, %v414_v14  ;;  %v669_v14 = vadd.f32 %v1798_v63, %v1740_v1 }
 0x106   : > { %v875_v19 = vpop.f32.mrf.mxu2 }
 0x107   : > { %v1806_v18 = vpop.f32.mrf.mxu3  ;;  %v945_v20 = vadd.f32 %v875_v19, %v627_v16 }
 0x109   : > { %v981_v21 = vadd.f32 %v1706_v40, %v945_v20  ;;  %v417_v22 = vpop.f32.mrf.mxu0 }
 0x10a   : > { %v629_v23 = vpop.f32.mrf.mxu1 }
 0x10b   : > { %1013 = vst [vmem:[%s1712_s30 + $0x68] sm:$0xff] %v981_v21  ;;  %v630_v24 = vadd.f32 %v629_v23, %v417_v22 }
 0x10e   : > { %v878_v29 = vpop.f32.mrf.mxu2 }
 0x10f   : > { %v1810_v27 = vpop.f32.mrf.mxu3  ;;  %v946_v30 = vadd.f32 %v878_v29, %v630_v24  ;;  %v672_v24 = vadd.f32 %v1802_v8, %v1750_v9 }
 0x111   : > { %v982_v31 = vadd.f32 %v1706_v40, %v946_v30  ;;  %v420_v32 = vpop.f32.mrf.mxu0 }
 0x112   : > { %v632_v33 = vpop.f32.mrf.mxu1 }
 0x113   : > { %1014 = vst [vmem:[%s1712_s30 + $0x70] sm:$0xff] %v982_v31  ;;  %v633_v6 = vadd.f32 %v632_v33, %v420_v32 }
 0x116   : > { %v881_v35 = vpop.f32.mrf.mxu2 }
 0x117   : > { %v1814_v34 = vpop.f32.mrf.mxu3  ;;  %v947_v36 = vadd.f32 %v881_v35, %v633_v6 }
 0x119   : > { %v983_v37 = vadd.f32 %v1706_v40, %v947_v36  ;;  %v423_v38 = vpop.f32.mrf.mxu0  ;;  %v675_v36 = vadd.f32 %v1806_v18, %v1760_v17 }
 0x11a   : > { %v635_v10 = vpop.f32.mrf.mxu1 }
 0x11b   : > { %1015 = vst [vmem:[%s1712_s30 + $0x78] sm:$0xff] %v983_v37  ;;  %v636_v42 = vadd.f32 %v635_v10, %v423_v38 }
 0x11e   : > { %v884_v28 = vpop.f32.mrf.mxu2 }
 0x11f   : > { %v908_v44 = vpop.f32.mrf.mxu3  ;;  %v948_v45 = vadd.f32 %v884_v28, %v636_v42 }
 0x120   : > { %v956_v46 = vadd.f32 %v908_v44, %v660_v43 }
 0x121   : > { %v984_v48 = vadd.f32 %v1706_v40, %v948_v45  ;;  %v426_v51 = vpop.f32.mrf.mxu0  ;;  %v678_v45 = vadd.f32 %v1810_v27, %v1771_v25  ;;  %v681_v25 = vadd.f32 %v1814_v34, %v1782_v26 }
 0x122   : > { %v992_v50 = vadd.f32 %v1706_v40, %v956_v46  ;;  %v638_v52 = vpop.f32.mrf.mxu1 }
 0x123   : > { %1016 = vst [vmem:[%s1712_s30 + $0x80] sm:$0xff] %v984_v48  ;;  %v639_v53 = vadd.f32 %v638_v52, %v426_v51 }
 0x124   : > { %1024 = vst [vmem:[%s1712_s30 + $0xc0] sm:$0xff] %v992_v50 }
 0x126   : > { %v887_v56 = vpop.f32.mrf.mxu2 }
 0x127   : > { %v911_v41 = vpop.f32.mrf.mxu3  ;;  %v949_v39 = vadd.f32 %v887_v56, %v639_v53 }
 0x128   : > { %v957_v58 = vadd.f32 %v911_v41, %v663_v54 }
 0x129   : > { %v985_v59 = vadd.f32 %v1706_v40, %v949_v39  ;;  %v429_v61 = vpop.f32.mrf.mxu0 }
 0x12a   : > { %v993_v60 = vadd.f32 %v1706_v40, %v957_v58  ;;  %v641_v62 = vpop.f32.mrf.mxu1 }
 0x12b   : > { %1017 = vst [vmem:[%s1712_s30 + $0x88] sm:$0xff] %v985_v59  ;;  %v642_v0 = vadd.f32 %v641_v62, %v429_v61 }
 0x12c   : > { %1025 = vst [vmem:[%s1712_s30 + $0xc8] sm:$0xff] %v993_v60 }
 0x12e   : > { %v890_v3 = vpop.f32.mrf.mxu2 }
 0x12f   : > { %v914_v49 = vpop.f32.mrf.mxu3  ;;  %v950_v47 = vadd.f32 %v890_v3, %v642_v0 }
 0x130   : > { %v958_v4 = vadd.f32 %v914_v49, %v666_v2 }
 0x131   : > { %v986_v5 = vadd.f32 %v1706_v40, %v950_v47  ;;  %v432_v11 = vpop.f32.mrf.mxu0 }
 0x132   : > { %v994_v7 = vadd.f32 %v1706_v40, %v958_v4  ;;  %v644_v12 = vpop.f32.mrf.mxu1 }
 0x133   : > { %1018 = vst [vmem:[%s1712_s30 + $0x90] sm:$0xff] %v986_v5  ;;  %v645_v13 = vadd.f32 %v644_v12, %v432_v11 }
 0x134   : > { %1026 = vst [vmem:[%s1712_s30 + $0xd0] sm:$0xff] %v994_v7 }
 0x136   : > { %v893_v15 = vpop.f32.mrf.mxu2 }
 0x137   : > { %v917_v57 = vpop.f32.mrf.mxu3  ;;  %v951_v55 = vadd.f32 %v893_v15, %v645_v13 }
 0x138   : > { %v959_v16 = vadd.f32 %v917_v57, %v669_v14 }
 0x139   : > { %v987_v19 = vadd.f32 %v1706_v40, %v951_v55  ;;  %v435_v21 = vpop.f32.mrf.mxu0 }
 0x13a   : > { %v995_v20 = vadd.f32 %v1706_v40, %v959_v16  ;;  %v647_v22 = vpop.f32.mrf.mxu1 }
 0x13b   : > { %1019 = vst [vmem:[%s1712_s30 + $0x98] sm:$0xff] %v987_v19  ;;  %v648_v23 = vadd.f32 %v647_v22, %v435_v21 }
 0x13c   : > { %1027 = vst [vmem:[%s1712_s30 + $0xd8] sm:$0xff] %v995_v20 }
 0x13e   : > { %v896_v29 = vpop.f32.mrf.mxu2 }
 0x13f   : > { %v920_v1 = vpop.f32.mrf.mxu3  ;;  %v952_v63 = vadd.f32 %v896_v29, %v648_v23 }
 0x140   : > { %v960_v30 = vadd.f32 %v920_v1, %v672_v24 }
 0x141   : > { %v988_v31 = vadd.f32 %v1706_v40, %v952_v63  ;;  %v438_v33 = vpop.f32.mrf.mxu0 }
 0x142   : > { %v996_v32 = vadd.f32 %v1706_v40, %v960_v30  ;;  %v650_v6 = vpop.f32.mrf.mxu1 }
 0x143   : > { %1020 = vst [vmem:[%s1712_s30 + $0xa0] sm:$0xff] %v988_v31  ;;  %v651_v35 = vadd.f32 %v650_v6, %v438_v33 }
 0x144   : > { %1028 = vst [vmem:[%s1712_s30 + $0xe0] sm:$0xff] %v996_v32 }
 0x146   : > { %v899_v37 = vpop.f32.mrf.mxu2 }
 0x147   : > { %v923_v9 = vpop.f32.mrf.mxu3  ;;  %v953_v8 = vadd.f32 %v899_v37, %v651_v35 }
 0x148   : > { %v961_v38 = vadd.f32 %v923_v9, %v675_v36 }
 0x149   : > { %v989_v10 = vadd.f32 %v1706_v40, %v953_v8  ;;  %v441_v43 = vpop.f32.mrf.mxu0 }
 0x14a   : > { %v997_v42 = vadd.f32 %v1706_v40, %v961_v38  ;;  %v653_v28 = vpop.f32.mrf.mxu1 }
 0x14b   : > { %1021 = vst [vmem:[%s1712_s30 + $0xa8] sm:$0xff] %v989_v10  ;;  %v654_v44 = vadd.f32 %v653_v28, %v441_v43 }
 0x14c   : > { %1029 = vst [vmem:[%s1712_s30 + $0xe8] sm:$0xff] %v997_v42 }
 0x14e   : > { %v902_v17 = vpop.f32.mrf.mxu2 }
 0x14f   : > { %v926_v18 = vpop.f32.mrf.mxu3  ;;  %v954_v46 = vadd.f32 %v902_v17, %v654_v44 }
 0x150   : > { %v962_v48 = vadd.f32 %v926_v18, %v678_v45 }
 0x151   : > { %v990_v50 = vadd.f32 %v1706_v40, %v954_v46  ;;  %v444_v52 = vpop.f32.mrf.mxu0 }
 0x152   : > { %v998_v51 = vadd.f32 %v1706_v40, %v962_v48  ;;  %v656_v53 = vpop.f32.mrf.mxu1 }
 0x153   : > { %1022 = vst [vmem:[%s1712_s30 + $0xb0] sm:$0xff] %v990_v50  ;;  %v657_v54 = vadd.f32 %v656_v53, %v444_v52 }
 0x154   : > { %1030 = vst [vmem:[%s1712_s30 + $0xf0] sm:$0xff] %v998_v51 }
 0x156   : > { %v905_v27 = vpop.f32.mrf.mxu2 }
 0x157   : > { %v929_v56 = vpop.f32.mrf.mxu3  ;;  %v955_v41 = vadd.f32 %v905_v27, %v657_v54 }
 0x158   : > { %v963_v39 = vadd.f32 %v929_v56, %v681_v25 }
 0x159   : > { %v991_v58 = vadd.f32 %v1706_v40, %v955_v41 }
 0x15a   : > { %v999_v59 = vadd.f32 %v1706_v40, %v963_v39 }
 0x15b   : > { %1023 = vst [vmem:[%s1712_s30 + $0xb8] sm:$0xff] %v991_v58 }
 0x15c   : > { %1031 = vst [vmem:[%s1712_s30 + $0xf8] sm:$0xff] %v999_v59 }
 0x15d   : > { %1403 = shalt.err (!%p1400_p5)
}
 0x15e   : > { %s1456_s26 = smov 128   ;;  %s1457_s28 = smov 8  }
 0x15f   : > { %1318 = dma.vmem_to_hbm [thread:$0]  (%p1518_p4), %s1048_s15, 4096, %s1050_s8, %s1033_s9, %s1456_s26, %s1456_s26, %s1457_s28  }
 0x160 PF: > { %p1324_p6 = scmp.ge.s32.totalorder %s1454_s17, 2  ;;  %s1064_s29 = sand.u32 1, %s1434_s12  }
 0x161   : > { %s1065_s30 = scalar_lea.sflag [#allocation3], %s1064_s29 }
 0x162   : > { %p1321_p7 = pnand %p1324_p6, %p1525_p8 }
 0x164   : > { %p1322_p9 = pneg %p1321_p7 }
 0x166   : > { %1429 = dma.done.wait (%p1322_p9), %s1065_s30, 4096  }
 0x167   : > { %1431 = vsyncadd (%p1322_p9), %s1065_s30, 4294963200  ;;  %s16_s17 = sadd.s32 1, %s1454_s17   ;;  %s1911_s12 = smov %s1438_s13 }
 0x168   : > { %p13_p10 = scmp.ge.s32.totalorder %s16_s17, 4   ;;  %s1912_s13 = smov %s1442_s14 }
 0x169   : > { %s1913_s14 = smov %s1531_s25  ;;  %s1914_s15 = smov %s1450_s16 }
 0x16a   : > { %s1915_s16 = smov %s1917_s20  ;;  %15 = sbr.rel (!%p13_p10) target bundleno = 4 (0x4), region = 72 }
 0x16f   :  { %1071 = vsyncpa [#allocation3], 1 }
 0x170   :  { %1073 = vsyncpa [#allocation3 + $0x1], 1 }

// kernel: tpu_custom_call.1
= control target key start
LH: loop header
LB: loop body
LE: loop exit
PB: predicated region body
PF: predicated region fallthrough
CT: control target
= control target key end

     0   :  { %8 = vsyncpa [#allocation3], 0  ;;  %s1905_s0 = inlined_call_operand.vmem [shape: f32[2,288,12], index: 0, kind: input, shape index: {}]   ;;  %s1906_s1 = inlined_call_operand.vmem [shape: f32[3,12,128], index: 1, kind: input, shape index: {}]   ;;  %s1907_s2 = inlined_call_operand.vmem [shape: f32[1,128], index: 2, kind: input, shape index: {}]   ;;  %s1908_s3 = inlined_call_operand.hbm [shape: f32[2,256,128], index: 3, kind: output, shape index: {}]  }
   0x1   :  { %10 = vsyncpa [#allocation3 + $0x1], 0  ;;  %s1478_s12 = smov 0   ;;  %s1480_s13 = smov 0  }
   0x2   :  { %s1482_s14 = smov 0   ;;  %s1484_s15 = smov 0  }
   0x3   :  { %s1486_s16 = smov 0   ;;  %s1488_s17 = smov 0  }
   0x4 LB: > { %s1131_s18 = sadd.s32 4294967295, %s1454_s17   ;;  %s1132_s19 = sadd.s32 4294967294, %s1454_s17   ;;  %s1454_s17 = sphi %s1488_s17, %s16_s17   ;;  %s1450_s16 = sphi %s1486_s16, %s1915_s16   ;;  %s1446_s15 = sphi %s1484_s15, %s1914_s15   ;;  %s1442_s14 = sphi %s1482_s14, %s1913_s14   ;;  %s1438_s13 = sphi %s1480_s13, %s1912_s13   ;;  %s1434_s12 = sphi %s1478_s12, %s1911_s12  }
   0x5   : > { %s28_s20 = sadd.s32 1, %s1450_s16  ;;  %s105_s21 = sadd.s32 1, %s1442_s14 }
   0x6   : > { %p30_p0 = scmp.ge.s32.totalorder %s28_s20, 2  ;;  %p115_p1 = scmp.ne.s32.totalorder %s1442_s14, %s1438_s13 }
   0x7   : > { %p116_p2 = scmp.eq.s32.totalorder %s1131_s18, 1  ;;  %p121_p3 = scmp.ne.s32.totalorder %s1438_s13, %s1434_s12 }
   0x8   : > { %s1917_s20 = smov (%p30_p0, %s28_s20), 0  ;;  %p122_p5 = scmp.eq.s32.totalorder %s1132_s19, 1 }
   0x9   : > { %p1518_p4 = por %p116_p2, %p115_p1  ;;  %s100_s23 = ssub.s32 %s1450_s16, %s1917_s20 }
   0xa   : > { %p1135_p6 = scmp.ge.s32.totalorder %s1454_s17, 1  ;;  %p103_p7 = scmp.eq.s32.totalorder %s100_s23, 0 }
   0xb   : > { %p1525_p8 = por %p122_p5, %p121_p3  ;;  %p154_p9 = scmp.lt.s32.totalorder %s1454_s17, 3 }
   0xc   : > { %s1531_s25 = scalar_select %p103_p7, %s1442_s14, %s105_s21  }
   0xd   : > { %p155_p10 = pnand %p1135_p6, %p154_p9 }
   0xe   : > { %p178_p11 = scmp.lt.s32.totalorder (!%p155_p10), %s1446_s15, 1  ;;  %s175_s26 = sand.u32 (!%p155_p10), 1, %s1438_s13  }
   0xf   : > { %158 = sbr.rel (%p155_p10) target bundleno = 352 (0x160), region = 32  ;;  %s1136_s27 = sshll.u32 (!%p155_p10), %s175_s26, 8 }
  0x10   : > { %s1712_s30 = scalar_lea.vmem (!%p155_p10), [#allocation2], %s1136_s27  ;;  %s1310_s4 = sshll.u32 (!%p155_p10), %s1446_s15, 8 }
  0x11   : > { %s1046_s7 = scalar_lea.hbm (!%p155_p10), %s1908_s3, %s1310_s4  ;;  %s1033_s9 = scalar_lea.sflag (!%p155_p10), [#allocation3], %s175_s26 }
  0x12   : > { %s1049_s8 = sshll.u32 (!%p155_p10), %s1046_s7, 4  ;;  %s1396_s21 = scalar_lea.hbm (!%p155_p10), %s1908_s3, 512  ;;  %s1050_s8 = int_to_ptr.hbm [resolvable:$true] %s1049_s8 }
  0x13   : > { %s1390_s10 = sshra.s32 (!%p155_p10), %s1050_s8, 4  ;;  %s1391_s10 = int_to_ptr.hbm [resolvable:$true] %s1390_s10 }
  0x14   : > { %v1171_v0 = vld [vmem:[%s1906_s1 + $0x18] sm:$0xf]  ;;  %vm354_vm0 = vcmask 1043456   ;;  %v1271_v1 = vld [vmem:[%s1906_s1 + $0x28] sm:$0xf]  ;;  %v1170_v2 = vld [vmem:[%s1906_s1 + $0x10] sm:$0xff]  ;;  %p1397_p1 = scmp.lt.s32.totalorder %s1391_s10, %s1908_s3 }
  0x15   : > { %1311 = vmatpush.msk.msra.mxu3 %vm354_vm0, %v1171_v0  ;;  %1272 = vmatpush.msk.msra.mxu2 %vm354_vm0, %v1271_v1  ;;  %v1270_v3 = vld [vmem:[%s1906_s1 + $0x20] sm:$0xff]  ;;  %v219_v4 = vld [vmem:[%s1906_s1 + $0x8] sm:$0xf]  ;;  %s179_s11 = scalar_select %p178_p11, %s1446_s15, 1  ;;  %vm257_vm1 = vcmask 97280  }
  0x16   : > { %1172 = vmatpush.msk.msra.mxu0 %vm354_vm0, %v1171_v0  ;;  %1205 = vmatpush.msk.msra.mxu1 %vm354_vm0, %v219_v4  ;;  %v218_v5 = vld [vmem:[%s1906_s1] sm:$0xff]  ;;  %s1047_s15 = sshll.u32 %s1712_s30, 4  ;;  %s1048_s15 = int_to_ptr.vmem [resolvable:$true] %s1047_s15 }
  0x17   : > { %1312 = vmatpush.msra.mxu3 %v1170_v2  ;;  %834 = vmatpush.msra.mxu2 %v1270_v3  ;;  %s1317_s18 = smul.u32 288, %s179_s11  ;;  %v1706_v40 = vld [vmem:[%s1907_s2] ss:$0 sm:$0xff]  ;;  %s1392_s11 = scalar_lea.hbm %s1391_s10, 256 }
  0x18   : > { %373 = vmatpush.msra.mxu0 %v1170_v2  ;;  %585 = vmatpush.msra.mxu1 %v218_v5  ;;  %p1393_p12 = scmp.ne.s32.totalorder %s1391_s10, %s1392_s11  ;;  %p1398_p2 = scmp.lt.s32.totalorder %s1396_s21, %s1392_s11 }
  0x19   : > { %1313 = vmatpush.msk.msrb.mxu3 %vm354_vm0, %v219_v4  ;;  %s1561_s23 = scalar_lea.vmem %s1905_s0, %s1317_s18 }
  0x1a   : > { %v1564_v6 = vld [vmem:[%s1561_s23 + $0xd0] sm:$0xff]  ;;  %v1238_v7 = vld [vmem:[%s1561_s23 + $0x20] sm:$0xff]  ;;  %v1576_v10 = vld [vmem:[%s1561_s23 + $0xd8] sm:$0xff]  ;;  %p1394_p13 = pnand %p1393_p12, %p1518_p4  ;;  %p1399_p3 = por %p1398_p2, %p1397_p1 }
  0x1b   : > { %1314 = vmatpush.msrb.mxu3 %v218_v5  ;;  %v1138_v8 = vld [vmem:[%s1561_s23 + $0x10] sm:$0xff]  ;;  %1273 = vmatmul.msk.f32.vlgmr.msra.gmra.mxu2 %vm257_vm1, %v1238_v7  ;;  %v186_v9 = vld [vmem:[%s1561_s23] sm:$0xff]  ;;  %v1239_v11 = vld [vmem:[%s1561_s23 + $0x28] sm:$0xff] }
  0x1c   : > { %1197 = vmatmul.msk.f32.vlgmr.msra.gmra.mxu3 %vm257_vm1, %v1564_v6  ;;  %1173 = vmatmul.msk.f32.vlgmr.msra.gmra.mxu0 %vm257_vm1, %v1138_v8  ;;  %v1139_v12 = vld [vmem:[%s1561_s23 + $0x18] sm:$0xff]  ;;  %v187_v13 = vld [vmem:[%s1561_s23 + $0x8] sm:$0xff]  ;;  %v1587_v14 = vld [vmem:[%s1561_s23 + $0xe0] sm:$0xff]  ;;  %p1395_p0 = pneg %p1394_p13 }
  0x1d   : > { %1206 = vmatmul.msk.f32.vlgmr.msra.gmra.mxu1 %vm257_vm1, %v186_v9  ;;  %1315 = vmatpush.msk.msra.mxu3 %vm354_vm0, %v1271_v1  ;;  %v1240_v15 = vld [vmem:[%s1561_s23 + $0x30] sm:$0xff]  ;;  %v1596_v16 = vld [vmem:[%s1561_s23 + $0xe8] sm:$0xff]  ;;  %v1241_v17 = vld [vmem:[%s1561_s23 + $0x38] sm:$0xff] }
  0x1e   : > { %v1605_v18 = vld [vmem:[%s1561_s23 + $0xf0] sm:$0xff]  ;;  %v1242_v19 = vld [vmem:[%s1561_s23 + $0x40] sm:$0xff]  ;;  %v1614_v20 = vld [vmem:[%s1561_s23 + $0xf8] sm:$0xff]  ;;  %p1400_p5 = pnand %p1399_p3, %p1395_p0 }
  0x1f   : > { %1316 = vmatpush.msra.mxu3 %v1270_v3  ;;  %v1243_v21 = vld [vmem:[%s1561_s23 + $0x48] sm:$0xff]  ;;  %v1623_v22 = vld [vmem:[%s1561_s23 + $0x100] sm:$0xff]  ;;  %v1244_v23 = vld [vmem:[%s1561_s23 + $0x50] sm:$0xff] }
  0x20   : > { %v1632_v24 = vld [vmem:[%s1561_s23 + $0x108] sm:$0xff]  ;;  %v1245_v25 = vld [vmem:[%s1561_s23 + $0x58] sm:$0xff]  ;;  %v1641_v26 = vld [vmem:[%s1561_s23 + $0xc0] sm:$0xff] }
  0x21   : > { %v1246_v27 = vld [vmem:[%s1561_s23 + $0x60] sm:$0xff]  ;;  %v1650_v28 = vld [vmem:[%s1561_s23 + $0xc8] sm:$0xff]  ;;  %v1248_v30 = vld [vmem:[%s1561_s23 + $0x70] sm:$0xff] }
  0x22   : > { %v1247_v29 = vld [vmem:[%s1561_s23 + $0x68] sm:$0xff]  ;;  %v1249_v31 = vld [vmem:[%s1561_s23 + $0x78] sm:$0xff]  ;;  %v1250_v32 = vld [vmem:[%s1561_s23 + $0x80] sm:$0xff] }
  0x23   : > { %1274 = vmatmul.msk.f32.gmra.mxu2 %vm257_vm1, %v1239_v11  ;;  %v1251_v33 = vld [vmem:[%s1561_s23 + $0x88] sm:$0xff]  ;;  %v1252_v34 = vld [vmem:[%s1561_s23 + $0x90] sm:$0xff]  ;;  %v1253_v35 = vld [vmem:[%s1561_s23 + $0x98] sm:$0xff] }
  0x24   : > { %1198 = vmatmul.msk.f32.gmra.mxu3 %vm257_vm1, %v1576_v10  ;;  %1174 = vmatmul.msk.f32.gmra.mxu0 %vm257_vm1, %v1139_v12  ;;  %v1254_v36 = vld [vmem:[%s1561_s23 + $0xa0] sm:$0xff]  ;;  %v1255_v44 = vld [vmem:[%s1561_s23 + $0xa8] sm:$0xff]  ;;  %v1256_v52 = vld [vmem:[%s1561_s23 + $0xb0] sm:$0xff] }
  0x25   : > { %1207 = vmatmul.msk.f32.gmra.mxu1 %vm257_vm1, %v187_v13  ;;  %v1257_v60 = vld [vmem:[%s1561_s23 + $0xb8] sm:$0xff] }
  0x2b   : > { %1275 = vmatmul.msk.f32.gmra.mxu2 %vm257_vm1, %v1240_v15 }
  0x2c   : > { %1199 = vmatmul.msk.f32.gmra.mxu3 %vm257_vm1, %v1587_v14  ;;  %1175 = vmatmul.msk.f32.gmra.mxu0 %vm257_vm1, %v1238_v7 }
  0x2d   : > { %1208 = vmatmul.msk.f32.gmra.mxu1 %vm257_vm1, %v1138_v8 }
  0x33   : > { %1276 = vmatmul.msk.f32.gmra.mxu2 %vm257_vm1, %v1241_v17 }
  0x34   : > { %1200 = vmatmul.msk.f32.gmra.mxu3 %vm257_vm1, %v1596_v16  ;;  %1176 = vmatmul.msk.f32.gmra.mxu0 %vm257_vm1, %v1239_v11 }
  0x35   : > { %1209 = vmatmul.msk.f32.gmra.mxu1 %vm257_vm1, %v1139_v12 }
  0x3b   : > { %1277 = vmatmul.msk.f32.gmra.mxu2 %vm257_vm1, %v1242_v19 }
  0x3c   : > { %1201 = vmatmul.msk.f32.gmra.mxu3 %vm257_vm1, %v1605_v18  ;;  %1177 = vmatmul.msk.f32.gmra.mxu0 %vm257_vm1, %v1240_v15 }
  0x3d   : > { %1210 = vmatmul.msk.f32.gmra.mxu1 %vm257_vm1, %v1238_v7 }
  0x43   : > { %1278 = vmatmul.msk.f32.gmra.mxu2 %vm257_vm1, %v1243_v21 }
  0x44   : > { %1202 = vmatmul.msk.f32.gmra.mxu3 %vm257_vm1, %v1614_v20  ;;  %1178 = vmatmul.msk.f32.gmra.mxu0 %vm257_vm1, %v1241_v17 }
  0x45   : > { %1211 = vmatmul.msk.f32.gmra.mxu1 %vm257_vm1, %v1239_v11 }
  0x4b   : > { %1279 = vmatmul.msk.f32.gmra.mxu2 %vm257_vm1, %v1244_v23 }
  0x4c   : > { %1203 = vmatmul.msk.f32.gmra.mxu3 %vm257_vm1, %v1623_v22  ;;  %1179 = vmatmul.msk.f32.gmra.mxu0 %vm257_vm1, %v1242_v19 }
  0x4d   : > { %1212 = vmatmul.msk.f32.gmra.mxu1 %vm257_vm1, %v1240_v15 }
  0x53   : > { %1280 = vmatmul.msk.f32.gmra.mxu2 %vm257_vm1, %v1245_v25 }
  0x54   : > { %1204 = vmatmul.msk.f32.gmra.mxu3 %vm257_vm1, %v1632_v24  ;;  %1180 = vmatmul.msk.f32.gmra.mxu0 %vm257_vm1, %v1243_v21 }
  0x55   : > { %1213 = vmatmul.msk.f32.gmra.mxu1 %vm257_vm1, %v1241_v17 }
  0x5b   : > { %1281 = vmatmul.msk.f32.gmra.mxu2 %vm257_vm1, %v1246_v27 }
  0x5c   : > { %1230 = vmatmul.msk.f32.vlgmr.msrb.gmra.mxu3 %vm257_vm1, %v1641_v26  ;;  %1181 = vmatmul.msk.f32.gmra.mxu0 %vm257_vm1, %v1244_v23 }
  0x5d   : > { %1214 = vmatmul.msk.f32.gmra.mxu1 %vm257_vm1, %v1242_v19 }
  0x63   : > { %1282 = vmatmul.msk.f32.gmra.mxu2 %vm257_vm1, %v1247_v29 }
  0x64   : > { %1231 = vmatmul.msk.f32.gmra.mxu3 %vm257_vm1, %v1650_v28  ;;  %1182 = vmatmul.msk.f32.gmra.mxu0 %vm257_vm1, %v1245_v25 }
  0x65   : > { %1215 = vmatmul.msk.f32.gmra.mxu1 %vm257_vm1, %v1243_v21 }
  0x6b   : > { %1283 = vmatmul.msk.f32.gmra.mxu2 %vm257_vm1, %v1248_v30 }
  0x6c   : > { %1232 = vmatmul.msk.f32.gmra.mxu3 %vm257_vm1, %v1564_v6  ;;  %1183 = vmatmul.msk.f32.gmra.mxu0 %vm257_vm1, %v1246_v27 }
  0x6d   : > { %1216 = vmatmul.msk.f32.gmra.mxu1 %vm257_vm1, %v1244_v23 }
  0x73   : > { %1284 = vmatmul.msk.f32.gmra.mxu2 %vm257_vm1, %v1249_v31 }
  0x74   : > { %1233 = vmatmul.msk.f32.gmra.mxu3 %vm257_vm1, %v1576_v10  ;;  %1184 = vmatmul.msk.f32.gmra.mxu0 %vm257_vm1, %v1247_v29 }
  0x75   : > { %1217 = vmatmul.msk.f32.gmra.mxu1 %vm257_vm1, %v1245_v25 }
  0x7b   : > { %1285 = vmatmul.msk.f32.gmra.mxu2 %vm257_vm1, %v1250_v32 }
  0x7c   : > { %1234 = vmatmul.msk.f32.gmra.mxu3 %vm257_vm1, %v1587_v14  ;;  %1185 = vmatmul.msk.f32.gmra.mxu0 %vm257_vm1, %v1248_v30 }
  0x7d   : > { %1218 = vmatmul.msk.f32.gmra.mxu1 %vm257_vm1, %v1246_v27 }
  0x83   : > { %1286 = vmatmul.msk.f32.gmra.mxu2 %vm257_vm1, %v1251_v33 }
  0x84   : > { %1235 = vmatmul.msk.f32.gmra.mxu3 %vm257_vm1, %v1596_v16  ;;  %1186 = vmatmul.msk.f32.gmra.mxu0 %vm257_vm1, %v1249_v31 }
  0x85   : > { %1219 = vmatmul.msk.f32.gmra.mxu1 %vm257_vm1, %v1247_v29 }
  0x8b   : > { %1287 = vmatmul.msk.f32.gmra.mxu2 %vm257_vm1, %v1252_v34 }
  0x8c   : > { %1236 = vmatmul.msk.f32.gmra.mxu3 %vm257_vm1, %v1605_v18  ;;  %1187 = vmatmul.msk.f32.gmra.mxu0 %vm257_vm1, %v1250_v32 }
  0x8d   : > { %1220 = vmatmul.msk.f32.gmra.mxu1 %vm257_vm1, %v1248_v30  ;;  %v1269_v30 = vld [vmem:[%s1561_s23 + $0x118] sm:$0xff] }
  0x93   : > { %1288 = vmatmul.msk.f32.gmra.mxu2 %vm257_vm1, %v1253_v35 }
  0x94   : > { %1237 = vmatmul.msk.f32.gmra.mxu3 %vm257_vm1, %v1614_v20  ;;  %1188 = vmatmul.msk.f32.gmra.mxu0 %vm257_vm1, %v1251_v33 }
  0x95   : > { %1221 = vmatmul.msk.f32.gmra.mxu1 %vm257_vm1, %v1249_v31 }
  0x99   : > { %v375_v37 = vpop.f32.mrf.mxu0 }
  0x9a   : > { %v587_v38 = vpop.f32.mrf.mxu1 }
  0x9b   : > { %1289 = vmatmul.msk.f32.gmra.mxu2 %vm257_vm1, %v1254_v36  ;;  %v588_v39 = vadd.f32 %v587_v38, %v375_v37 }
  0x9c   : > { %1297 = vmatmul.msk.f32.vlgmr.msra.gmra.mxu3 %vm257_vm1, %v1587_v14  ;;  %1189 = vmatmul.msk.f32.gmra.mxu0 %vm257_vm1, %v1252_v34 }
  0x9d   : > { %1222 = vmatmul.msk.f32.gmra.mxu1 %vm257_vm1, %v1250_v32 }
  0x9e   : > { %v836_v42 = vpop.f32.mrf.mxu2 }
  0x9f   : > { %v1708_v41 = vpop.f32.mrf.mxu3  ;;  %v932_v43 = vadd.f32 %v836_v42, %v588_v39 }
  0xa1   : > { %v968_v45 = vadd.f32 %v1706_v40, %v932_v43  ;;  %v378_v46 = vpop.f32.mrf.mxu0 }
  0xa2   : > { %v590_v47 = vpop.f32.mrf.mxu1 }
  0xa3   : > { %1000 = vst [vmem:[%s1712_s30] sm:$0xff] %v968_v45  ;;  %1290 = vmatmul.msk.f32.gmra.mxu2 %vm257_vm1, %v1255_v44  ;;  %v591_v48 = vadd.f32 %v590_v47, %v378_v46 }
  0xa4   : > { %1298 = vmatmul.msk.f32.gmra.mxu3 %vm257_vm1, %v1596_v16  ;;  %1190 = vmatmul.msk.f32.gmra.mxu0 %vm257_vm1, %v1253_v35 }
  0xa5   : > { %1223 = vmatmul.msk.f32.gmra.mxu1 %vm257_vm1, %v1251_v33 }
  0xa6   : > { %v839_v50 = vpop.f32.mrf.mxu2 }
  0xa7   : > { %v1720_v49 = vpop.f32.mrf.mxu3  ;;  %v933_v51 = vadd.f32 %v839_v50, %v591_v48 }
  0xa9   : > { %v969_v53 = vadd.f32 %v1706_v40, %v933_v51  ;;  %v381_v54 = vpop.f32.mrf.mxu0 }
  0xaa   : > { %v593_v55 = vpop.f32.mrf.mxu1 }
  0xab   : > { %1001 = vst [vmem:[%s1712_s30 + $0x8] sm:$0xff] %v969_v53  ;;  %1291 = vmatmul.msk.f32.gmra.mxu2 %vm257_vm1, %v1256_v52  ;;  %v594_v56 = vadd.f32 %v593_v55, %v381_v54 }
  0xac   : > { %1299 = vmatmul.msk.f32.gmra.mxu3 %vm257_vm1, %v1605_v18  ;;  %1191 = vmatmul.msk.f32.gmra.mxu0 %vm257_vm1, %v1254_v36 }
  0xad   : > { %1224 = vmatmul.msk.f32.gmra.mxu1 %vm257_vm1, %v1252_v34 }
  0xae   : > { %v842_v58 = vpop.f32.mrf.mxu2 }
  0xaf   : > { %v1730_v57 = vpop.f32.mrf.mxu3  ;;  %v934_v59 = vadd.f32 %v842_v58, %v594_v56 }
  0xb1   : > { %v970_v61 = vadd.f32 %v1706_v40, %v934_v59  ;;  %v384_v62 = vpop.f32.mrf.mxu0 }
  0xb2   : > { %v596_v63 = vpop.f32.mrf.mxu1 }
  0xb3   : > { %1002 = vst [vmem:[%s1712_s30 + $0x10] sm:$0xff] %v970_v61  ;;  %1292 = vmatmul.msk.f32.gmra.mxu2 %vm257_vm1, %v1257_v60  ;;  %v597_v0 = vadd.f32 %v596_v63, %v384_v62 }
  0xb4   : > { %1300 = vmatmul.msk.f32.gmra.mxu3 %vm257_vm1, %v1614_v20  ;;  %1192 = vmatmul.msk.f32.gmra.mxu0 %vm257_vm1, %v1255_v44  ;;  %v1268_v20 = vld [vmem:[%s1561_s23 + $0x110] sm:$0xff] }
  0xb5   : > { %1225 = vmatmul.msk.f32.gmra.mxu1 %vm257_vm1, %v1253_v35 }
  0xb6   : > { %v845_v2 = vpop.f32.mrf.mxu2 }
  0xb7   : > { %v1740_v1 = vpop.f32.mrf.mxu3  ;;  %v935_v3 = vadd.f32 %v845_v2, %v597_v0 }
  0xb9   : > { %v971_v4 = vadd.f32 %v1706_v40, %v935_v3  ;;  %v387_v5 = vpop.f32.mrf.mxu0 }
  0xba   : > { %v599_v7 = vpop.f32.mrf.mxu1 }
  0xbb   : > { %1003 = vst [vmem:[%s1712_s30 + $0x18] sm:$0xff] %v971_v4  ;;  %1293 = vmatmul.msk.f32.gmra.mxu2 %vm257_vm1, %v1641_v26  ;;  %v600_v8 = vadd.f32 %v599_v7, %v387_v5 }
  0xbc   : > { %1301 = vmatmul.msk.f32.gmra.mxu3 %vm257_vm1, %v1623_v22  ;;  %1193 = vmatmul.msk.f32.gmra.mxu0 %vm257_vm1, %v1256_v52 }
  0xbd   : > { %1226 = vmatmul.msk.f32.gmra.mxu1 %vm257_vm1, %v1254_v36 }
  0xbe   : > { %v848_v11 = vpop.f32.mrf.mxu2 }
  0xbf   : > { %v1750_v9 = vpop.f32.mrf.mxu3  ;;  %v936_v12 = vadd.f32 %v848_v11, %v600_v8 }
  0xc1   : > { %v972_v13 = vadd.f32 %v1706_v40, %v936_v12  ;;  %v390_v14 = vpop.f32.mrf.mxu0 }
  0xc2   : > { %v602_v15 = vpop.f32.mrf.mxu1 }
  0xc3   : > { %1004 = vst [vmem:[%s1712_s30 + $0x20] sm:$0xff] %v972_v13  ;;  %1294 = vmatmul.msk.f32.gmra.mxu2 %vm257_vm1, %v1650_v28  ;;  %v603_v16 = vadd.f32 %v602_v15, %v390_v14 }
  0xc4   : > { %1302 = vmatmul.msk.f32.gmra.mxu3 %vm257_vm1, %v1632_v24  ;;  %1194 = vmatmul.msk.f32.gmra.mxu0 %vm257_vm1, %v1257_v60 }
  0xc5   : > { %1227 = vmatmul.msk.f32.gmra.mxu1 %vm257_vm1, %v1255_v44 }
  0xc6   : > { %v851_v18 = vpop.f32.mrf.mxu2 }
  0xc7   : > { %v1760_v17 = vpop.f32.mrf.mxu3  ;;  %v937_v19 = vadd.f32 %v851_v18, %v603_v16 }
  0xc9   : > { %v973_v21 = vadd.f32 %v1706_v40, %v937_v19  ;;  %v393_v22 = vpop.f32.mrf.mxu0 }
  0xca   : > { %v605_v23 = vpop.f32.mrf.mxu1 }
  0xcb   : > { %1005 = vst [vmem:[%s1712_s30 + $0x28] sm:$0xff] %v973_v21  ;;  %1295 = vmatmul.msk.f32.gmra.mxu2 %vm257_vm1, %v1564_v6  ;;  %v606_v24 = vadd.f32 %v605_v23, %v393_v22 }
  0xcc   : > { %1303 = vmatmul.msk.f32.gmra.mxu3 %vm257_vm1, %v1268_v20  ;;  %1195 = vmatmul.msk.f32.gmra.mxu0 %vm257_vm1, %v1641_v26 }
  0xcd   : > { %1228 = vmatmul.msk.f32.gmra.mxu1 %vm257_vm1, %v1256_v52 }
  0xce   : > { %v854_v27 = vpop.f32.mrf.mxu2 }
  0xcf   : > { %v1771_v25 = vpop.f32.mrf.mxu3  ;;  %v938_v29 = vadd.f32 %v854_v27, %v606_v24 }
  0xd1   : > { %v974_v31 = vadd.f32 %v1706_v40, %v938_v29  ;;  %v396_v32 = vpop.f32.mrf.mxu0 }
  0xd2   : > { %v608_v33 = vpop.f32.mrf.mxu1 }
  0xd3   : > { %1006 = vst [vmem:[%s1712_s30 + $0x30] sm:$0xff] %v974_v31  ;;  %1296 = vmatmul.msk.f32.gmra.mxu2 %vm257_vm1, %v1576_v10  ;;  %v609_v6 = vadd.f32 %v608_v33, %v396_v32 }
  0xd4   : > { %1304 = vmatmul.msk.f32.gmra.mxu3 %vm257_vm1, %v1269_v30  ;;  %1196 = vmatmul.msk.f32.gmra.mxu0 %vm257_vm1, %v1650_v28 }
  0xd5   : > { %1229 = vmatmul.msk.f32.gmra.mxu1 %vm257_vm1, %v1257_v60 }
  0xd6   : > { %v857_v34 = vpop.f32.mrf.mxu2 }
  0xd7   : > { %v1782_v26 = vpop.f32.mrf.mxu3  ;;  %v939_v35 = vadd.f32 %v857_v34, %v609_v6 }
  0xd9   : > { %v975_v36 = vadd.f32 %v1706_v40, %v939_v35  ;;  %v399_v37 = vpop.f32.mrf.mxu0 }
  0xda   : > { %v611_v38 = vpop.f32.mrf.mxu1 }
  0xdb   : > { %1007 = vst [vmem:[%s1712_s30 + $0x38] sm:$0xff] %v975_v36  ;;  %v612_v10 = vadd.f32 %v611_v38, %v399_v37 }
  0xde   : > { %v860_v42 = vpop.f32.mrf.mxu2 }
  0xdf   : > { %v1786_v39 = vpop.f32.mrf.mxu3  ;;  %v940_v43 = vadd.f32 %v860_v42, %v612_v10 }
  0xe1   : > { %v976_v28 = vadd.f32 %v1706_v40, %v940_v43  ;;  %v402_v44 = vpop.f32.mrf.mxu0  ;;  %v660_v43 = vadd.f32 %v1786_v39, %v1708_v41 }
  0xe2   : > { %v614_v45 = vpop.f32.mrf.mxu1 }
  0xe3   : > { %1008 = vst [vmem:[%s1712_s30 + $0x40] sm:$0xff] %v976_v28  ;;  %v615_v46 = vadd.f32 %v614_v45, %v402_v44 }
  0xe6   : > { %v863_v48 = vpop.f32.mrf.mxu2 }
  0xe7   : > { %v1790_v47 = vpop.f32.mrf.mxu3  ;;  %v941_v50 = vadd.f32 %v863_v48, %v615_v46 }
  0xe9   : > { %v977_v51 = vadd.f32 %v1706_v40, %v941_v50  ;;  %v405_v52 = vpop.f32.mrf.mxu0 }
  0xea   : > { %v617_v53 = vpop.f32.mrf.mxu1 }
  0xeb   : > { %1009 = vst [vmem:[%s1712_s30 + $0x48] sm:$0xff] %v977_v51  ;;  %v618_v54 = vadd.f32 %v617_v53, %v405_v52 }
  0xee   : > { %v866_v56 = vpop.f32.mrf.mxu2 }
  0xef   : > { %v1794_v55 = vpop.f32.mrf.mxu3  ;;  %v942_v58 = vadd.f32 %v866_v56, %v618_v54  ;;  %v663_v54 = vadd.f32 %v1790_v47, %v1720_v49 }
  0xf1   : > { %v978_v59 = vadd.f32 %v1706_v40, %v942_v58  ;;  %v408_v60 = vpop.f32.mrf.mxu0 }
  0xf2   : > { %v620_v61 = vpop.f32.mrf.mxu1 }
  0xf3   : > { %1010 = vst [vmem:[%s1712_s30 + $0x50] sm:$0xff] %v978_v59  ;;  %v621_v62 = vadd.f32 %v620_v61, %v408_v60 }
  0xf6   : > { %v869_v0 = vpop.f32.mrf.mxu2 }
  0xf7   : > { %v1798_v63 = vpop.f32.mrf.mxu3  ;;  %v943_v2 = vadd.f32 %v869_v0, %v621_v62 }
  0xf9   : > { %v979_v3 = vadd.f32 %v1706_v40, %v943_v2  ;;  %v411_v4 = vpop.f32.mrf.mxu0  ;;  %v666_v2 = vadd.f32 %v1794_v55, %v1730_v57 }
  0xfa   : > { %v623_v5 = vpop.f32.mrf.mxu1 }
  0xfb   : > { %1011 = vst [vmem:[%s1712_s30 + $0x58] sm:$0xff] %v979_v3  ;;  %v624_v7 = vadd.f32 %v623_v5, %v411_v4 }
  0xfe   : > { %v872_v11 = vpop.f32.mrf.mxu2 }
  0xff   : > { %v1802_v8 = vpop.f32.mrf.mxu3  ;;  %v944_v12 = vadd.f32 %v872_v11, %v624_v7 }
 0x101   : > { %v980_v13 = vadd.f32 %v1706_v40, %v944_v12  ;;  %v414_v14 = vpop.f32.mrf.mxu0 }
 0x102   : > { %v626_v15 = vpop.f32.mrf.mxu1 }
 0x103   : > { %1012 = vst [vmem:[%s1712_s30 + $0x60] sm:$0xff] %v980_v13  ;;  %v627_v16 = vadd.f32 %v626_v15, %v414_v14  ;;  %v669_v14 = vadd.f32 %v1798_v63, %v1740_v1 }
 0x106   : > { %v875_v19 = vpop.f32.mrf.mxu2 }
 0x107   : > { %v1806_v18 = vpop.f32.mrf.mxu3  ;;  %v945_v20 = vadd.f32 %v875_v19, %v627_v16 }
 0x109   : > { %v981_v21 = vadd.f32 %v1706_v40, %v945_v20  ;;  %v417_v22 = vpop.f32.mrf.mxu0 }
 0x10a   : > { %v629_v23 = vpop.f32.mrf.mxu1 }
 0x10b   : > { %1013 = vst [vmem:[%s1712_s30 + $0x68] sm:$0xff] %v981_v21  ;;  %v630_v24 = vadd.f32 %v629_v23, %v417_v22 }
 0x10e   : > { %v878_v29 = vpop.f32.mrf.mxu2 }
 0x10f   : > { %v1810_v27 = vpop.f32.mrf.mxu3  ;;  %v946_v30 = vadd.f32 %v878_v29, %v630_v24  ;;  %v672_v24 = vadd.f32 %v1802_v8, %v1750_v9 }
 0x111   : > { %v982_v31 = vadd.f32 %v1706_v40, %v946_v30  ;;  %v420_v32 = vpop.f32.mrf.mxu0 }
 0x112   : > { %v632_v33 = vpop.f32.mrf.mxu1 }
 0x113   : > { %1014 = vst [vmem:[%s1712_s30 + $0x70] sm:$0xff] %v982_v31  ;;  %v633_v6 = vadd.f32 %v632_v33, %v420_v32 }
 0x116   : > { %v881_v35 = vpop.f32.mrf.mxu2 }
 0x117   : > { %v1814_v34 = vpop.f32.mrf.mxu3  ;;  %v947_v36 = vadd.f32 %v881_v35, %v633_v6 }
 0x119   : > { %v983_v37 = vadd.f32 %v1706_v40, %v947_v36  ;;  %v423_v38 = vpop.f32.mrf.mxu0  ;;  %v675_v36 = vadd.f32 %v1806_v18, %v1760_v17 }
 0x11a   : > { %v635_v10 = vpop.f32.mrf.mxu1 }
 0x11b   : > { %1015 = vst [vmem:[%s1712_s30 + $0x78] sm:$0xff] %v983_v37  ;;  %v636_v42 = vadd.f32 %v635_v10, %v423_v38 }
 0x11e   : > { %v884_v28 = vpop.f32.mrf.mxu2 }
 0x11f   : > { %v908_v44 = vpop.f32.mrf.mxu3  ;;  %v948_v45 = vadd.f32 %v884_v28, %v636_v42 }
 0x120   : > { %v956_v46 = vadd.f32 %v908_v44, %v660_v43 }
 0x121   : > { %v984_v48 = vadd.f32 %v1706_v40, %v948_v45  ;;  %v426_v51 = vpop.f32.mrf.mxu0  ;;  %v678_v45 = vadd.f32 %v1810_v27, %v1771_v25  ;;  %v681_v25 = vadd.f32 %v1814_v34, %v1782_v26 }
 0x122   : > { %v992_v50 = vadd.f32 %v1706_v40, %v956_v46  ;;  %v638_v52 = vpop.f32.mrf.mxu1 }
 0x123   : > { %1016 = vst [vmem:[%s1712_s30 + $0x80] sm:$0xff] %v984_v48  ;;  %v639_v53 = vadd.f32 %v638_v52, %v426_v51 }
 0x124   : > { %1024 = vst [vmem:[%s1712_s30 + $0xc0] sm:$0xff] %v992_v50 }
 0x126   : > { %v887_v56 = vpop.f32.mrf.mxu2 }
 0x127   : > { %v911_v41 = vpop.f32.mrf.mxu3  ;;  %v949_v39 = vadd.f32 %v887_v56, %v639_v53 }
 0x128   : > { %v957_v58 = vadd.f32 %v911_v41, %v663_v54 }
 0x129   : > { %v985_v59 = vadd.f32 %v1706_v40, %v949_v39  ;;  %v429_v61 = vpop.f32.mrf.mxu0 }
 0x12a   : > { %v993_v60 = vadd.f32 %v1706_v40, %v957_v58  ;;  %v641_v62 = vpop.f32.mrf.mxu1 }
 0x12b   : > { %1017 = vst [vmem:[%s1712_s30 + $0x88] sm:$0xff] %v985_v59  ;;  %v642_v0 = vadd.f32 %v641_v62, %v429_v61 }
 0x12c   : > { %1025 = vst [vmem:[%s1712_s30 + $0xc8] sm:$0xff] %v993_v60 }
 0x12e   : > { %v890_v3 = vpop.f32.mrf.mxu2 }
 0x12f   : > { %v914_v49 = vpop.f32.mrf.mxu3  ;;  %v950_v47 = vadd.f32 %v890_v3, %v642_v0 }
 0x130   : > { %v958_v4 = vadd.f32 %v914_v49, %v666_v2 }
 0x131   : > { %v986_v5 = vadd.f32 %v1706_v40, %v950_v47  ;;  %v432_v11 = vpop.f32.mrf.mxu0 }
 0x132   : > { %v994_v7 = vadd.f32 %v1706_v40, %v958_v4  ;;  %v644_v12 = vpop.f32.mrf.mxu1 }
 0x133   : > { %1018 = vst [vmem:[%s1712_s30 + $0x90] sm:$0xff] %v986_v5  ;;  %v645_v13 = vadd.f32 %v644_v12, %v432_v11 }
 0x134   : > { %1026 = vst [vmem:[%s1712_s30 + $0xd0] sm:$0xff] %v994_v7 }
 0x136   : > { %v893_v15 = vpop.f32.mrf.mxu2 }
 0x137   : > { %v917_v57 = vpop.f32.mrf.mxu3  ;;  %v951_v55 = vadd.f32 %v893_v15, %v645_v13 }
 0x138   : > { %v959_v16 = vadd.f32 %v917_v57, %v669_v14 }
 0x139   : > { %v987_v19 = vadd.f32 %v1706_v40, %v951_v55  ;;  %v435_v21 = vpop.f32.mrf.mxu0 }
 0x13a   : > { %v995_v20 = vadd.f32 %v1706_v40, %v959_v16  ;;  %v647_v22 = vpop.f32.mrf.mxu1 }
 0x13b   : > { %1019 = vst [vmem:[%s1712_s30 + $0x98] sm:$0xff] %v987_v19  ;;  %v648_v23 = vadd.f32 %v647_v22, %v435_v21 }
 0x13c   : > { %1027 = vst [vmem:[%s1712_s30 + $0xd8] sm:$0xff] %v995_v20 }
 0x13e   : > { %v896_v29 = vpop.f32.mrf.mxu2 }
 0x13f   : > { %v920_v1 = vpop.f32.mrf.mxu3  ;;  %v952_v63 = vadd.f32 %v896_v29, %v648_v23 }
 0x140   : > { %v960_v30 = vadd.f32 %v920_v1, %v672_v24 }
 0x141   : > { %v988_v31 = vadd.f32 %v1706_v40, %v952_v63  ;;  %v438_v33 = vpop.f32.mrf.mxu0 }
 0x142   : > { %v996_v32 = vadd.f32 %v1706_v40, %v960_v30  ;;  %v650_v6 = vpop.f32.mrf.mxu1 }
 0x143   : > { %1020 = vst [vmem:[%s1712_s30 + $0xa0] sm:$0xff] %v988_v31  ;;  %v651_v35 = vadd.f32 %v650_v6, %v438_v33 }
 0x144   : > { %1028 = vst [vmem:[%s1712_s30 + $0xe0] sm:$0xff] %v996_v32 }
 0x146   : > { %v899_v37 = vpop.f32.mrf.mxu2 }
 0x147   : > { %v923_v9 = vpop.f32.mrf.mxu3  ;;  %v953_v8 = vadd.f32 %v899_v37, %v651_v35 }
 0x148   : > { %v961_v38 = vadd.f32 %v923_v9, %v675_v36 }
 0x149   : > { %v989_v10 = vadd.f32 %v1706_v40, %v953_v8  ;;  %v441_v43 = vpop.f32.mrf.mxu0 }
 0x14a   : > { %v997_v42 = vadd.f32 %v1706_v40, %v961_v38  ;;  %v653_v28 = vpop.f32.mrf.mxu1 }
 0x14b   : > { %1021 = vst [vmem:[%s1712_s30 + $0xa8] sm:$0xff] %v989_v10  ;;  %v654_v44 = vadd.f32 %v653_v28, %v441_v43 }
 0x14c   : > { %1029 = vst [vmem:[%s1712_s30 + $0xe8] sm:$0xff] %v997_v42 }
 0x14e   : > { %v902_v17 = vpop.f32.mrf.mxu2 }
 0x14f   : > { %v926_v18 = vpop.f32.mrf.mxu3  ;;  %v954_v46 = vadd.f32 %v902_v17, %v654_v44 }
 0x150   : > { %v962_v48 = vadd.f32 %v926_v18, %v678_v45 }
 0x151   : > { %v990_v50 = vadd.f32 %v1706_v40, %v954_v46  ;;  %v444_v52 = vpop.f32.mrf.mxu0 }
 0x152   : > { %v998_v51 = vadd.f32 %v1706_v40, %v962_v48  ;;  %v656_v53 = vpop.f32.mrf.mxu1 }
 0x153   : > { %1022 = vst [vmem:[%s1712_s30 + $0xb0] sm:$0xff] %v990_v50  ;;  %v657_v54 = vadd.f32 %v656_v53, %v444_v52 }
 0x154   : > { %1030 = vst [vmem:[%s1712_s30 + $0xf0] sm:$0xff] %v998_v51 }
 0x156   : > { %v905_v27 = vpop.f32.mrf.mxu2 }
 0x157   : > { %v929_v56 = vpop.f32.mrf.mxu3  ;;  %v955_v41 = vadd.f32 %v905_v27, %v657_v54 }
 0x158   : > { %v963_v39 = vadd.f32 %v929_v56, %v681_v25 }
 0x159   : > { %v991_v58 = vadd.f32 %v1706_v40, %v955_v41 }
 0x15a   : > { %v999_v59 = vadd.f32 %v1706_v40, %v963_v39 }
 0x15b   : > { %1023 = vst [vmem:[%s1712_s30 + $0xb8] sm:$0xff] %v991_v58 }
 0x15c   : > { %1031 = vst [vmem:[%s1712_s30 + $0xf8] sm:$0xff] %v999_v59 }
 0x15d   : > { %1403 = shalt.err (!%p1400_p5)
}
 0x15e   : > { %s1456_s26 = smov 128   ;;  %s1457_s28 = smov 8  }
 0x15f   : > { %1318 = dma.vmem_to_hbm [thread:$0]  (%p1518_p4), %s1048_s15, 4096, %s1050_s8, %s1033_s9, %s1456_s26, %s1456_s26, %s1457_s28  }
 0x160 PF: > { %p1324_p6 = scmp.ge.s32.totalorder %s1454_s17, 2  ;;  %s1064_s29 = sand.u32 1, %s1434_s12  }
 0x161   : > { %s1065_s30 = scalar_lea.sflag [#allocation3], %s1064_s29 }
 0x162   : > { %p1321_p7 = pnand %p1324_p6, %p1525_p8 }
 0x164   : > { %p1322_p9 = pneg %p1321_p7 }
 0x166   : > { %1429 = dma.done.wait (%p1322_p9), %s1065_s30, 4096  }
 0x167   : > { %1431 = vsyncadd (%p1322_p9), %s1065_s30, 4294963200  ;;  %s16_s17 = sadd.s32 1, %s1454_s17   ;;  %s1911_s12 = smov %s1438_s13 }
 0x168   : > { %p13_p10 = scmp.ge.s32.totalorder %s16_s17, 4   ;;  %s1912_s13 = smov %s1442_s14 }
 0x169   : > { %s1913_s14 = smov %s1531_s25  ;;  %s1914_s15 = smov %s1450_s16 }
 0x16a   : > { %s1915_s16 = smov %s1917_s20  ;;  %15 = sbr.rel (!%p13_p10) target bundleno = 4 (0x4), region = 72 }
 0x16f   :  { %1071 = vsyncpa [#allocation3], 1 }
 0x170   :  { %1073 = vsyncpa [#allocation3 + $0x1], 1 }

</bundles_post_ra>
